<compile_context>
chip_gen: v5e
topology: v5e:2x2
jax: 0.10.0
libtpu: 0.0.40
codegen_flags: <defaults>
</compile_context>

<pallas_src>
import functools
import math

import jax
import jax.numpy as jnp
from jax.experimental import pallas as pl
from jax.experimental.pallas import tpu as pltpu


def _round_up(v, m):
    return ((v + m - 1) // m) * m


def _leaky(v):
    return jnp.where(v > 0, v, 0.2 * v)


# ----------------------------- fused Pallas kernel ---------------------------

def _fused_block_kernel(patch_ref, w1p_ref, b1p_ref, w2_ref, b2_ref,
                        o_ref, h1s_ref, *, Ho, Wo, P, Pp, top, bot):
    """One batch image per grid step.

    patch_ref : (1, M, 9*Cin)  im2col of the stride-2 3x3 conv1 (center tap is
                               also the 1x1-stride-2 projection input)
    w1p_ref   : (9*Cin, 2*Pp)  [w1 | embedded proj] -> conv1 + skip in one matmul
    b1p_ref   : (1, 2*Pp)      [b1 | bp]
    w2_ref    : (3, 3*Pp, Pp)  conv2 weights grouped by kernel row (K = 3*Pp)
    b2_ref    : (1, Pp)
    o_ref     : (1, M, P)      unpadded output channels
    h1s_ref   : (top + M + bot, Pp)  flat row-padded conv1 activation scratch
    """
    M = Ho * Wo

    # ---- conv1 + skip projection: ONE MXU pass (M, 9Cin) x (9Cin, 2Pp) ------
    z = jnp.dot(patch_ref[0], w1p_ref[...], preferred_element_type=jnp.float32)
    z = z + b1p_ref[...]
    h1 = _leaky(z[:, :Pp])          # conv1 act; padded channels are exact zeros
    skip = z[:, Pp:]                # SN(proj)(x) + bp

    # ---- h1 stays in VMEM only: flat (M, Pp) with zero row-borders ----------
    # Borders are never written by any other path -> zero them once.
    @pl.when(pl.program_id(0) == 0)
    def _():
        h1s_ref[pl.ds(0, top)] = jnp.zeros((top, Pp), jnp.float32)
        h1s_ref[pl.ds(top + M, bot)] = jnp.zeros((bot, Pp), jnp.float32)

    h1s_ref[pl.ds(top, M)] = h1

    # Column-edge masks: the flat row-major layout wraps across image rows for
    # the dx = +-1 taps, so zero those positions (c == 0 / c == Wo-1).
    col = jax.lax.broadcasted_iota(jnp.int32, (M, Pp), 0) % Wo
    not_first = col > 0
    not_last = col < (Wo - 1)

    # ---- conv2: 3 matmuls, the 3 taps of one kernel row fused along K -------
    acc = None
    for dy in (-1, 0, 1):
        base = top + dy * Wo                      # static, 8-aligned (Wo % 8 == 0 here)
        center = h1 if dy == 0 else h1s_ref[pl.ds(base, M)]
        left = jnp.where(not_first, h1s_ref[pl.ds(base - 1, M)], 0.0)
        right = jnp.where(not_last, h1s_ref[pl.ds(base + 1, M)], 0.0)
        g = jnp.concatenate([left, center, right], axis=1)        # (M, 3*Pp)
        mm = jnp.dot(g, w2_ref[dy + 1], preferred_element_type=jnp.float32)
        acc = mm if acc is None else acc + mm

    y = _leaky(acc + b2_ref[...])

    # ---- residual add; store only the real P output channels ----------------
    o_ref[0] = (y + skip)[:, :P].astype(o_ref.dtype)


# ------------------------------ public wrapper --------------------------------

def _f32_tile_bytes(shape):
    """Honest VMEM bytes of a block: pad to (8, 128) f32 tiles."""
    s = list(shape)
    if len(s) == 1:
        s = [1] + s
    s[-1] = _round_up(s[-1], 128)
    s[-2] = _round_up(s[-2], 8)
    n = 4
    for d in s:
        n *= d
    return n


@functools.partial(jax.jit, static_argnames=("kernel_size", "stride"))
def residual_cc_block_first_down(x_nchw, params, *, kernel_size=3, stride=2):
    """Forward pass. Input/output NCHW (PyTorch convention), float32."""
    if kernel_size != 3 or stride != 2:
        # TODO(synk): only the module defaults (3x3, stride 2) are fused here.
        raise NotImplementedError("fused kernel supports kernel_size=3, stride=2")

    x = x_nchw.astype(jnp.float32)
    B, Cin, H, W = x.shape
    assert H % 2 == 0 and W % 2 == 0, "even spatial dims expected"
    P = params["w1"].shape[-1]
    Pp = _round_up(P, 128)                  # lane-dense planes for in-kernel compute
    Ho, Wo = H // 2, W // 2
    M = Ho * Wo
    K1 = 9 * Cin
    top = _round_up(Wo + 1, 8)              # zero row-border sizes of the h1 scratch
    bot = top

    # im2col for the stride-2 3x3 conv.  The center tap (ky=kx=1) is exactly
    # x[2r, 2c], i.e. the input of the 1x1 stride-2 skip projection, so no
    # separate skip input stream is needed.
    xp = jnp.pad(x, ((0, 0), (0, 0), (1, 1), (1, 1)))
    cols = []
    for ky in range(3):
        for kx in range(3):
            c = xp[:, :, ky:ky + H:2, kx:kx + W:2]            # (B, Cin, Ho, Wo)
            cols.append(jnp.transpose(c, (0, 2, 3, 1)))       # (B, Ho, Wo, Cin)
    patch = jnp.concatenate(cols, axis=-1).reshape(B, M, K1)  # (B, M, 9*Cin)

    # conv1 and the skip projection share one (K1, 2*Pp) weight slab.
    w1 = jnp.pad(params["w1"].reshape(K1, P), ((0, 0), (0, Pp - P)))
    wp = params["wp"].reshape(Cin, P)
    wp_emb = jnp.zeros((K1, Pp), jnp.float32).at[4 * Cin:5 * Cin, :P].set(wp)
    w1p = jnp.concatenate([w1, wp_emb], axis=1)               # (K1, 2*Pp)
    b1p = jnp.concatenate([jnp.pad(params["b1"], ((0, 0), (0, Pp - P))),
                           jnp.pad(params["bp"], ((0, 0), (0, Pp - P)))], axis=1)

    w2 = jnp.pad(params["w2"], ((0, 0), (0, 0), (0, Pp - P), (0, Pp - P)))
    w2 = w2.reshape(3, 3 * Pp, Pp)                            # grouped by ky; (kx, cin) on K
    b2 = jnp.pad(params["b2"], ((0, 0), (0, Pp - P)))

    # Advisory cost + hardware-aware VMEM limit (tile-padded, double-buffered).
    flops = 2 * B * M * (K1 * 2 * Pp + 9 * Pp * Pp)
    bytes_accessed = 4 * (B * M * K1 + K1 * 2 * Pp + 2 * Pp
                          + 9 * Pp * Pp + Pp + B * M * P)
    cost = pl.CostEstimate(flops=flops, transcendentals=0,
                           bytes_accessed=bytes_accessed)

    in_blocks = [(1, M, K1), (K1, 2 * Pp), (1, 2 * Pp), (3, 3 * Pp, Pp), (1, Pp)]
    vmem_est = (2 * sum(_f32_tile_bytes(s) for s in in_blocks)   # dbl-buffered inputs
                + 2 * _f32_tile_bytes((1, M, P))                 # dbl-buffered output
                + _f32_tile_bytes((top + M + bot, Pp))           # h1 scratch
                + 16 * _f32_tile_bytes((M, Pp))                  # live values (z, taps, acc)
                + (2 << 20))                                     # compiler headroom
    try:
        vmem_cap = int(pltpu.get_tpu_info().vmem_capacity_bytes)
    except Exception:                                            # conservative: v7x per-core
        vmem_cap = 64 * 2 ** 20
    vmem_limit = int(min(max(vmem_est, 16 * 2 ** 20), int(0.8 * vmem_cap)))

    kern = functools.partial(_fused_block_kernel,
                             Ho=Ho, Wo=Wo, P=P, Pp=Pp, top=top, bot=bot)

    # Weight/bias blocks have constant index maps -> the pipeline skips their
    # redundant DMAs across grid steps.
    out = pl.pallas_call(
        kern,
        out_shape=jax.ShapeDtypeStruct((B, M, P), jnp.float32),
        grid_spec=pltpu.PrefetchScalarGridSpec(
            num_scalar_prefetch=0,
            grid=(B,),
            in_specs=[
                pl.BlockSpec((1, M, K1), lambda b: (b, 0, 0)),        # im2col patch
                pl.BlockSpec((K1, 2 * Pp), lambda b: (0, 0)),         # [w1 | proj]
                pl.BlockSpec((1, 2 * Pp), lambda b: (0, 0)),          # [b1 | bp]
                pl.BlockSpec((3, 3 * Pp, Pp), lambda b: (0, 0, 0)),   # w2 (SN'd)
                pl.BlockSpec((1, Pp), lambda b: (0, 0)),              # b2
            ],
            out_specs=pl.BlockSpec((1, M, P), lambda b: (b, 0, 0)),
            scratch_shapes=[pltpu.VMEM((top + M + bot, Pp), jnp.float32)],
        ),
        compiler_params=pltpu.CompilerParams(
            dimension_semantics=("parallel",),
            vmem_limit_bytes=vmem_limit),
        cost_estimate=cost,
    )(patch, w1p, b1p, w2, b2)

    out = out.reshape(B, Ho, Wo, P)
    return jnp.transpose(out, (0, 3, 1, 2))                    # back to NCHW


# --------------------------- parameter construction ---------------------------

def _kaiming_conv_hwio(key, k, cin, cout, a=0.2):
    # kaiming_normal_(a=0.2, mode='fan_in', nonlinearity='leaky_relu')
    fan_in = cin * k * k
    gain = math.sqrt(2.0 / (1.0 + a * a))
    std = gain / math.sqrt(fan_in)
    return std * jax.random.normal(key, (k, k, cin, cout), jnp.float32)


def _conv_bias(key, k, cin, cout):
    # PyTorch Conv2d default bias init: U(-1/sqrt(fan_in), 1/sqrt(fan_in))
    bound = 1.0 / math.sqrt(cin * k * k)
    return jax.random.uniform(key, (1, cout), jnp.float32, -bound, bound)


def _spectral_normalize(w_hwio, key, n_iter=1, eps=1e-12):
    # TODO(synk): emulates nn.utils.spectral_norm with a synthetic random u and
    # 1 power iteration (plain JAX, parameter-side); will not match a trained
    # PyTorch checkpoint's stored u.
    kh, kw, cin, cout = w_hwio.shape
    wmat = w_hwio.reshape(-1, cout).T        # (cout, kh*kw*cin)
    u = jax.random.normal(key, (cout,), jnp.float32)
    u = u / (jnp.linalg.norm(u) + eps)
    v = None
    for _ in range(n_iter):
        v = wmat.T @ u
        v = v / (jnp.linalg.norm(v) + eps)
        u = wmat @ v
        u = u / (jnp.linalg.norm(u) + eps)
    sigma = u @ (wmat @ v)
    return w_hwio / sigma


def init_params(key, inplanes, planes, kernel_size=3):
    k1, k2, k3, k4, k5, k6, k7, k8 = jax.random.split(key, 8)
    w1 = _kaiming_conv_hwio(k1, kernel_size, inplanes, planes)
    b1 = _conv_bias(k2, kernel_size, inplanes, planes)
    w2 = _kaiming_conv_hwio(k3, kernel_size, planes, planes)
    b2 = _conv_bias(k4, kernel_size, planes, planes)
    w2 = _spectral_normalize(w2, k5)
    wp = _kaiming_conv_hwio(k6, 1, inplanes, planes)
    bp = _conv_bias(k7, 1, inplanes, planes)
    wp = _spectral_normalize(wp, k8)
    return dict(w1=w1, b1=b1, w2=w2, b2=b2, wp=wp, bp=bp)


# ------------------------------ pure-JAX reference ----------------------------

def _reference(x_nchw, params, kernel_size=3, stride=2):
    x = jnp.transpose(x_nchw, (0, 2, 3, 1)).astype(jnp.float32)
    dn = ("NHWC", "HWIO", "NHWC")
    p = kernel_size // 2

    h = jax.lax.conv_general_dilated(x, params["w1"], (stride, stride),
                                     [(p, p), (p, p)], dimension_numbers=dn)
    h = _leaky(h + params["b1"].reshape(1, 1, 1, -1))
    h = jax.lax.conv_general_dilated(h, params["w2"], (1, 1),
                                     [(p, p), (p, p)], dimension_numbers=dn)
    h = _leaky(h + params["b2"].reshape(1, 1, 1, -1))
    s = jax.lax.conv_general_dilated(x, params["wp"], (stride, stride),
                                     [(0, 0), (0, 0)], dimension_numbers=dn)
    s = s + params["bp"].reshape(1, 1, 1, -1)
    return jnp.transpose(h + s, (0, 3, 1, 2))


# -------------------------------- main -----------------------------------------

if __name__ == "__main__":
    key = jax.random.PRNGKey(0)
    kx, kp = jax.random.split(key)

    B, inplanes, planes, H, W = 2, 4, 8, 16, 16
    x = jax.random.normal(kx, (B, inplanes, H, W), jnp.float32)   # NCHW
    params = init_params(kp, inplanes, planes)

    out = jax.block_until_ready(residual_cc_block_first_down(x, params))
    ref = jax.block_until_ready(_reference(x, params))

    assert out.shape == (B, planes, H // 2, W // 2), out.shape
    max_err = float(jnp.max(jnp.abs(out - ref)))
    assert jnp.allclose(out, ref, rtol=1e-3, atol=1e-3), max_err

    print("KERNEL_OK")
</pallas_src>

<mosaic_0001>
module attributes {stable_mosaic.version = 11 : i64} {
  func.func @_fused_block_kernel(%arg0: i32, %arg1: memref<1x64x36xf32, #tpu.memory_space<vmem>>, %arg2: memref<36x256xf32, #tpu.memory_space<vmem>>, %arg3: memref<1x256xf32, #tpu.memory_space<vmem>>, %arg4: memref<3x384x128xf32, #tpu.memory_space<vmem>>, %arg5: memref<1x128xf32, #tpu.memory_space<vmem>>, %arg6: memref<1x64x8xf32, #tpu.memory_space<vmem>>, %arg7: memref<96x128xf32, #tpu.memory_space<vmem>>) attributes {dimension_semantics = [#tpu.dimension_semantics<parallel>], iteration_bounds = array<i64: 2>, scalar_prefetch = 0 : i64, scratch_operands = 1 : i64, tpu.core_type = #tpu.core_type<tc>, window_params = [{transform_indices = @transform_0, window_bounds = array<i64: 1, 64, 36>}, {pipeline_mode = #tpu.pipeline_mode<synchronous>, transform_indices = @transform_1, window_bounds = array<i64: 36, 256>}, {pipeline_mode = #tpu.pipeline_mode<synchronous>, transform_indices = @transform_2, window_bounds = array<i64: 1, 256>}, {pipeline_mode = #tpu.pipeline_mode<synchronous>, transform_indices = @transform_3, window_bounds = array<i64: 3, 384, 128>}, {pipeline_mode = #tpu.pipeline_mode<synchronous>, transform_indices = @transform_4, window_bounds = array<i64: 1, 128>}, {transform_indices = @transform_5, window_bounds = array<i64: 1, 64, 8>}]} {
    %c0 = arith.constant 0 : index
    %c0_0 = arith.constant 0 : index
    %c0_1 = arith.constant 0 : index
    %0 = vector.load %arg1[%c0, %c0_0, %c0_1] : memref<1x64x36xf32, #tpu.memory_space<vmem>>, vector<1x64x36xf32>
    %1 = vector.shape_cast %0 : vector<1x64x36xf32> to vector<64x36xf32>
    %c0_2 = arith.constant 0 : index
    %c0_3 = arith.constant 0 : index
    %2 = vector.load %arg2[%c0_2, %c0_3] : memref<36x256xf32, #tpu.memory_space<vmem>>, vector<36x256xf32>
    %cst = arith.constant dense<0.000000e+00> : vector<64x256xf32>
    %3 = tpu.matmul %1, %2, %cst {dimension_numbers = #tpu.dot_dimension_numbers<[1], [0], [0], [1], [0, 0, 1, 1], [], []>} : vector<64x36xf32>, vector<36x256xf32>, vector<64x256xf32> -> vector<64x256xf32>
    %c0_4 = arith.constant 0 : index
    %c0_5 = arith.constant 0 : index
    %4 = vector.load %arg3[%c0_4, %c0_5] : memref<1x256xf32, #tpu.memory_space<vmem>>, vector<1x256xf32>
    %5 = vector.broadcast %4 : vector<1x256xf32> to vector<64x256xf32>
    %6 = arith.addf %3, %5 : vector<64x256xf32>
    %7 = vector.extract_strided_slice %6 {offsets = [0, 0], sizes = [64, 128], strides = [1, 1]} : vector<64x256xf32> to vector<64x128xf32>
    %cst_6 = arith.constant 0.000000e+00 : f32
    %8 = vector.broadcast %cst_6 : f32 to vector<64x128xf32>
    %9 = arith.cmpf ogt, %7, %8 : vector<64x128xf32>
    %cst_7 = arith.constant 2.000000e-01 : f32
    %10 = vector.broadcast %cst_7 : f32 to vector<64x128xf32>
    %11 = arith.mulf %10, %7 : vector<64x128xf32>
    %12 = arith.select %9, %7, %11 : vector<64x128xi1>, vector<64x128xf32>
    %13 = vector.extract_strided_slice %6 {offsets = [0, 128], sizes = [64, 128], strides = [1, 1]} : vector<64x256xf32> to vector<64x128xf32>
    %c0_i32 = arith.constant 0 : i32
    %14 = arith.cmpi eq, %arg0, %c0_i32 : i32
    %15 = arith.extui %14 : i1 to i32
    %c0_i32_8 = arith.constant 0 : i32
    %16 = arith.cmpi ne, %15, %c0_i32_8 : i32
    scf.if %16 {
      %cst_46 = arith.constant 0.000000e+00 : f32
      %86 = vector.broadcast %cst_46 : f32 to vector<16x128xf32>
      %c0_47 = arith.constant 0 : index
      %c0_48 = arith.constant 0 : index
      %87 = vector.load %arg7[%c0_47, %c0_48] : memref<96x128xf32, #tpu.memory_space<vmem>>, vector<16x128xf32>
      tpu.vector_store %arg7[%c0_47, %c0_48], %86 {strides = array<i32>} : memref<96x128xf32, #tpu.memory_space<vmem>>, vector<16x128xf32>,
      %cst_49 = arith.constant 0.000000e+00 : f32
      %88 = vector.broadcast %cst_49 : f32 to vector<16x128xf32>
      %c80 = arith.constant 80 : index
      %c0_50 = arith.constant 0 : index
      %89 = vector.load %arg7[%c80, %c0_50] : memref<96x128xf32, #tpu.memory_space<vmem>>, vector<16x128xf32>
      tpu.vector_store %arg7[%c80, %c0_50], %88 {strides = array<i32>} : memref<96x128xf32, #tpu.memory_space<vmem>>, vector<16x128xf32>,
    } else {
    }
    %c16 = arith.constant 16 : index
    %c0_9 = arith.constant 0 : index
    %17 = vector.load %arg7[%c16, %c0_9] : memref<96x128xf32, #tpu.memory_space<vmem>>, vector<64x128xf32>
    tpu.vector_store %arg7[%c16, %c0_9], %12 {strides = array<i32>} : memref<96x128xf32, #tpu.memory_space<vmem>>, vector<64x128xf32>,
    %18 = tpu.iota {dimensions = array<i32: 0>} : vector<64x128xi32>
    %c8_i32 = arith.constant 8 : i32
    %c0_i32_10 = arith.constant 0 : i32
    %19 = arith.cmpi eq, %c8_i32, %c0_i32_10 : i32
    %c1_i32 = arith.constant 1 : i32
    %20 = arith.select %19, %c1_i32, %c8_i32 : i32
    %21 = vector.broadcast %20 : i32 to vector<64x128xi32>
    %22 = arith.remsi %18, %21 : vector<64x128xi32>
    %c0_i32_11 = arith.constant 0 : i32
    %23 = vector.broadcast %c0_i32_11 : i32 to vector<64x128xi32>
    %24 = arith.cmpi ne, %22, %23 : vector<64x128xi32>
    %c0_i32_12 = arith.constant 0 : i32
    %25 = vector.broadcast %c0_i32_12 : i32 to vector<64x128xi32>
    %26 = arith.cmpi slt, %22, %25 : vector<64x128xi32>
    %c0_i32_13 = arith.constant 0 : i32
    %27 = arith.cmpi slt, %20, %c0_i32_13 : i32
    %28 = vector.broadcast %27 : i1 to vector<64x128xi1>
    %29 = vector.broadcast %28 : vector<64x128xi1> to vector<64x128xi1>
    %30 = arith.xori %26, %29 : vector<64x128xi1>
    %31 = arith.andi %30, %24 : vector<64x128xi1>
    %32 = vector.broadcast %20 : i32 to vector<64x128xi32>
    %33 = arith.addi %22, %32 : vector<64x128xi32>
    %34 = arith.select %31, %33, %22 : vector<64x128xi1>, vector<64x128xi32>
    %c0_i32_14 = arith.constant 0 : i32
    %35 = vector.broadcast %c0_i32_14 : i32 to vector<64x128xi32>
    %36 = arith.cmpi sgt, %34, %35 : vector<64x128xi32>
    %c7_i32 = arith.constant 7 : i32
    %37 = vector.broadcast %c7_i32 : i32 to vector<64x128xi32>
    %38 = arith.cmpi slt, %34, %37 : vector<64x128xi32>
    %c8 = arith.constant 8 : index
    %c0_15 = arith.constant 0 : index
    %39 = vector.load %arg7[%c8, %c0_15] : memref<96x128xf32, #tpu.memory_space<vmem>>, vector<64x128xf32>
    %c7 = arith.constant 7 : index
    %c0_16 = arith.constant 0 : index
    %40 = vector.load %arg7[%c7, %c0_16] : memref<96x128xf32, #tpu.memory_space<vmem>>, vector<64x128xf32>
    %cst_17 = arith.constant 0.000000e+00 : f32
    %41 = vector.broadcast %cst_17 : f32 to vector<64x128xf32>
    %42 = arith.select %36, %40, %41 : vector<64x128xi1>, vector<64x128xf32>
    %c9 = arith.constant 9 : index
    %c0_18 = arith.constant 0 : index
    %43 = vector.load %arg7[%c9, %c0_18] : memref<96x128xf32, #tpu.memory_space<vmem>>, vector<64x128xf32>
    %cst_19 = arith.constant 0.000000e+00 : f32
    %44 = vector.broadcast %cst_19 : f32 to vector<64x128xf32>
    %45 = arith.select %38, %43, %44 : vector<64x128xi1>, vector<64x128xf32>
    %46 = tpu.concatenate %42, %39, %45 in 1 : vector<64x128xf32>, vector<64x128xf32>, vector<64x128xf32> -> vector<64x384xf32>
    %c0_20 = arith.constant 0 : index
    %c0_21 = arith.constant 0 : index
    %c0_22 = arith.constant 0 : index
    %47 = vector.load %arg4[%c0_20, %c0_21, %c0_22] : memref<3x384x128xf32, #tpu.memory_space<vmem>>, vector<1x384x128xf32>
    %48 = vector.shape_cast %47 : vector<1x384x128xf32> to vector<384x128xf32>
    %cst_23 = arith.constant dense<0.000000e+00> : vector<64x128xf32>
    %49 = tpu.matmul %46, %48, %cst_23 {dimension_numbers = #tpu.dot_dimension_numbers<[1], [0], [0], [1], [0, 0, 1, 1], [], []>} : vector<64x384xf32>, vector<384x128xf32>, vector<64x128xf32> -> vector<64x128xf32>
    %c15 = arith.constant 15 : index
    %c0_24 = arith.constant 0 : index
    %50 = vector.load %arg7[%c15, %c0_24] : memref<96x128xf32, #tpu.memory_space<vmem>>, vector<64x128xf32>
    %cst_25 = arith.constant 0.000000e+00 : f32
    %51 = vector.broadcast %cst_25 : f32 to vector<64x128xf32>
    %52 = arith.select %36, %50, %51 : vector<64x128xi1>, vector<64x128xf32>
    %c17 = arith.constant 17 : index
    %c0_26 = arith.constant 0 : index
    %53 = vector.load %arg7[%c17, %c0_26] : memref<96x128xf32, #tpu.memory_space<vmem>>, vector<64x128xf32>
    %cst_27 = arith.constant 0.000000e+00 : f32
    %54 = vector.broadcast %cst_27 : f32 to vector<64x128xf32>
    %55 = arith.select %38, %53, %54 : vector<64x128xi1>, vector<64x128xf32>
    %56 = tpu.concatenate %52, %12, %55 in 1 : vector<64x128xf32>, vector<64x128xf32>, vector<64x128xf32> -> vector<64x384xf32>
    %c1 = arith.constant 1 : index
    %c0_28 = arith.constant 0 : index
    %c0_29 = arith.constant 0 : index
    %57 = vector.load %arg4[%c1, %c0_28, %c0_29] : memref<3x384x128xf32, #tpu.memory_space<vmem>>, vector<1x384x128xf32>
    %58 = vector.shape_cast %57 : vector<1x384x128xf32> to vector<384x128xf32>
    %cst_30 = arith.constant dense<0.000000e+00> : vector<64x128xf32>
    %59 = tpu.matmul %56, %58, %cst_30 {dimension_numbers = #tpu.dot_dimension_numbers<[1], [0], [0], [1], [0, 0, 1, 1], [], []>} : vector<64x384xf32>, vector<384x128xf32>, vector<64x128xf32> -> vector<64x128xf32>
    %60 = arith.addf %49, %59 : vector<64x128xf32>
    %c24 = arith.constant 24 : index
    %c0_31 = arith.constant 0 : index
    %61 = vector.load %arg7[%c24, %c0_31] : memref<96x128xf32, #tpu.memory_space<vmem>>, vector<64x128xf32>
    %c23 = arith.constant 23 : index
    %c0_32 = arith.constant 0 : index
    %62 = vector.load %arg7[%c23, %c0_32] : memref<96x128xf32, #tpu.memory_space<vmem>>, vector<64x128xf32>
    %cst_33 = arith.constant 0.000000e+00 : f32
    %63 = vector.broadcast %cst_33 : f32 to vector<64x128xf32>
    %64 = arith.select %36, %62, %63 : vector<64x128xi1>, vector<64x128xf32>
    %c25 = arith.constant 25 : index
    %c0_34 = arith.constant 0 : index
    %65 = vector.load %arg7[%c25, %c0_34] : memref<96x128xf32, #tpu.memory_space<vmem>>, vector<64x128xf32>
    %cst_35 = arith.constant 0.000000e+00 : f32
    %66 = vector.broadcast %cst_35 : f32 to vector<64x128xf32>
    %67 = arith.select %38, %65, %66 : vector<64x128xi1>, vector<64x128xf32>
    %68 = tpu.concatenate %64, %61, %67 in 1 : vector<64x128xf32>, vector<64x128xf32>, vector<64x128xf32> -> vector<64x384xf32>
    %c2 = arith.constant 2 : index
    %c0_36 = arith.constant 0 : index
    %c0_37 = arith.constant 0 : index
    %69 = vector.load %arg4[%c2, %c0_36, %c0_37] : memref<3x384x128xf32, #tpu.memory_space<vmem>>, vector<1x384x128xf32>
    %70 = vector.shape_cast %69 : vector<1x384x128xf32> to vector<384x128xf32>
    %cst_38 = arith.constant dense<0.000000e+00> : vector<64x128xf32>
    %71 = tpu.matmul %68, %70, %cst_38 {dimension_numbers = #tpu.dot_dimension_numbers<[1], [0], [0], [1], [0, 0, 1, 1], [], []>} : vector<64x384xf32>, vector<384x128xf32>, vector<64x128xf32> -> vector<64x128xf32>
    %72 = arith.addf %60, %71 : vector<64x128xf32>
    %c0_39 = arith.constant 0 : index
    %c0_40 = arith.constant 0 : index
    %73 = vector.load %arg5[%c0_39, %c0_40] : memref<1x128xf32, #tpu.memory_space<vmem>>, vector<1x128xf32>
    %74 = vector.broadcast %73 : vector<1x128xf32> to vector<64x128xf32>
    %75 = arith.addf %72, %74 : vector<64x128xf32>
    %cst_41 = arith.constant 0.000000e+00 : f32
    %76 = vector.broadcast %cst_41 : f32 to vector<64x128xf32>
    %77 = arith.cmpf ogt, %75, %76 : vector<64x128xf32>
    %cst_42 = arith.constant 2.000000e-01 : f32
    %78 = vector.broadcast %cst_42 : f32 to vector<64x128xf32>
    %79 = arith.mulf %78, %75 : vector<64x128xf32>
    %80 = arith.select %77, %75, %79 : vector<64x128xi1>, vector<64x128xf32>
    %81 = arith.addf %80, %13 : vector<64x128xf32>
    %82 = vector.extract_strided_slice %81 {offsets = [0, 0], sizes = [64, 8], strides = [1, 1]} : vector<64x128xf32> to vector<64x8xf32>
    %c0_43 = arith.constant 0 : index
    %c0_44 = arith.constant 0 : index
    %c0_45 = arith.constant 0 : index
    %83 = vector.load %arg6[%c0_43, %c0_44, %c0_45] : memref<1x64x8xf32, #tpu.memory_space<vmem>>, vector<1x64x8xf32>
    %84 = vector.shape_cast %83 : vector<1x64x8xf32> to vector<64x8xf32>
    %85 = vector.shape_cast %82 : vector<64x8xf32> to vector<1x64x8xf32>
    tpu.vector_store %arg6[%c0_43, %c0_44, %c0_45], %85 {strides = array<i32>} : memref<1x64x8xf32, #tpu.memory_space<vmem>>, vector<1x64x8xf32>,
    return
  }
  func.func @transform_0(%arg0: i32) -> (i32, i32, i32) {
    %c0_i32 = arith.constant 0 : i32
    %c0_i32_0 = arith.constant 0 : i32
    %c0_i32_1 = arith.constant 0 : i32
    return %arg0, %c0_i32, %c0_i32_0 : i32, i32, i32
  }
  func.func @transform_1(%arg0: i32) -> (i32, i32) {
    %c0_i32 = arith.constant 0 : i32
    %c0_i32_0 = arith.constant 0 : i32
    %c0_i32_1 = arith.constant 0 : i32
    return %c0_i32, %c0_i32_0 : i32, i32
  }
  func.func @transform_2(%arg0: i32) -> (i32, i32) {
    %c0_i32 = arith.constant 0 : i32
    %c0_i32_0 = arith.constant 0 : i32
    %c0_i32_1 = arith.constant 0 : i32
    return %c0_i32, %c0_i32_0 : i32, i32
  }
  func.func @transform_3(%arg0: i32) -> (i32, i32, i32) {
    %c0_i32 = arith.constant 0 : i32
    %c0_i32_0 = arith.constant 0 : i32
    %c0_i32_1 = arith.constant 0 : i32
    %c0_i32_2 = arith.constant 0 : i32
    return %c0_i32, %c0_i32_0, %c0_i32_1 : i32, i32, i32
  }
  func.func @transform_4(%arg0: i32) -> (i32, i32) {
    %c0_i32 = arith.constant 0 : i32
    %c0_i32_0 = arith.constant 0 : i32
    %c0_i32_1 = arith.constant 0 : i32
    return %c0_i32, %c0_i32_0 : i32, i32
  }
  func.func @transform_5(%arg0: i32) -> (i32, i32, i32) {
    %c0_i32 = arith.constant 0 : i32
    %c0_i32_0 = arith.constant 0 : i32
    %c0_i32_1 = arith.constant 0 : i32
    return %arg0, %c0_i32, %c0_i32_0 : i32, i32, i32
  }
}

</mosaic_0001>

<bundles_post_ra>
// kernel: residual_cc_block_first_down.1
= control target key start
LH: loop header
LB: loop body
LE: loop exit
PB: predicated region body
PF: predicated region fallthrough
CT: control target
= control target key end

     0   :  { %s1494_s18 = smov 0   ;;  %s2478_s0 = inlined_call_operand.vmem [shape: f32[2,64,36], index: 0, kind: input, shape index: {}]   ;;  %s2479_s1 = inlined_call_operand.vmem [shape: f32[36,256], index: 1, kind: input, shape index: {}]   ;;  %s2480_s2 = inlined_call_operand.vmem [shape: f32[1,256], index: 2, kind: input, shape index: {}]   ;;  %s2481_s3 = inlined_call_operand.vmem [shape: f32[3,384,128], index: 3, kind: input, shape index: {}]   ;;  %s2482_s4 = inlined_call_operand.vmem [shape: f32[1,128], index: 4, kind: input, shape index: {}]   ;;  %s2483_s5 = inlined_call_operand.vmem [shape: f32[2,64,8], index: 5, kind: output, shape index: {}]  }
   0x1 LB: > { %s1500_s19 = sadd.s32 4294967295, %s1461_s18   ;;  %p1257_p0 = scmp.ge.s32.totalorder %s1461_s18, 1  ;;  %s1461_s18 = sphi %s1494_s18, %s15_s18  }
   0x2   : > { %p187_p1 = scmp.lt.s32.totalorder %s1461_s18, 3 }
   0x4   : > { %p188_p2 = pnand %p1257_p0, %p187_p1 }
   0x6   : > { %191 = sbr.rel (%p188_p2) target bundleno = 541 (0x21d), region = 40 }
   0xb   : > { %v241_v0 = vld [vmem:[%s2479_s1 + $0x40] sm:$0xf]  ;;  %vm274_vm0 = vcmask 1043456   ;;  %v239_v1 = vld [vmem:[%s2479_s1 + $0x30] sm:$0xff]  ;;  %p215_p3 = scmp.lt.s32.totalorder %s1500_s19, 1  ;;  %v240_v3 = vld [vmem:[%s2479_s1 + $0x38] sm:$0xff] }
   0xc   : > { %1262 = vmatpush.msk.msra.mxu0 %vm274_vm0, %v241_v0  ;;  %v242_v2 = vld [vmem:[%s2479_s1 + $0x48] sm:$0xf]  ;;  %v237_v4 = vld [vmem:[%s2479_s1 + $0x20] sm:$0xff]  ;;  %v235_v6 = vld [vmem:[%s2479_s1 + $0x10] sm:$0xff]  ;;  %vm249_vm1 = vcmask 293888   ;;  %p1280_p4 = scmp.ne.s32.totalorder %s1500_s19, 0 }
   0xd   : > { %1271 = vmatpush.msk.msra.mxu1 %vm274_vm0, %v242_v2  ;;  %s216_s30 = scalar_select %p215_p3, %s1500_s19, 1  ;;  %v238_v5 = vld [vmem:[%s2479_s1 + $0x28] sm:$0xff]  ;;  %v236_v7 = vld [vmem:[%s2479_s1 + $0x18] sm:$0xff]  ;;  %v233_v8 = vld [vmem:[%s2479_s1] sm:$0xff] }
   0xe   : > { %293 = vmatpush.msra.mxu0 %v239_v1  ;;  %v234_v10 = vld [vmem:[%s2479_s1 + $0x8] sm:$0xff]  ;;  %v243_v18 = vld [vmem:[%s2480_s2] sm:$0x3] }
   0xf   : > { %334 = vmatpush.msra.mxu1 %v240_v3  ;;  %s1427_s10 = sshll.u32 %s216_s30, 6  ;;  %v245_v19 = vperm.slane %v243_v18, 0  ;;  %v246_v20 = vperm.slane %v243_v18, 1 }
  0x10   : > { %294 = vmatpush.msra.mxu0 %v237_v4  ;;  %s1530_s13 = scalar_lea.vmem %s2478_s0, %s1427_s10  ;;  %s1535_s16 = scalar_lea.vmem %s2483_s5, %s1427_s10 }
  0x11   : > { %335 = vmatpush.msra.mxu1 %v238_v5  ;;  %v225_v9 = vld [vmem:[%s1530_s13] sm:$0xff]  ;;  %v226_v11 = vld [vmem:[%s1530_s13 + $0x8] sm:$0xff]  ;;  %v227_v12 = vld [vmem:[%s1530_s13 + $0x10] sm:$0xff] }
  0x12   : > { %295 = vmatpush.msra.mxu0 %v235_v6  ;;  %v228_v13 = vld [vmem:[%s1530_s13 + $0x18] sm:$0xff]  ;;  %v229_v14 = vld [vmem:[%s1530_s13 + $0x20] sm:$0xff]  ;;  %v230_v15 = vld [vmem:[%s1530_s13 + $0x28] sm:$0xff] }
  0x13   : > { %336 = vmatpush.msra.mxu1 %v236_v7  ;;  %v231_v16 = vld [vmem:[%s1530_s13 + $0x30] sm:$0xff]  ;;  %v232_v17 = vld [vmem:[%s1530_s13 + $0x38] sm:$0xff] }
  0x14   : > { %296 = vmatpush.msra.mxu0 %v233_v8 }
  0x15   : > { %1263 = vmatmul.msk.f32.vlgmr.msra.gmra.mxu0 %vm249_vm1, %v225_v9  ;;  %337 = vmatpush.msra.mxu1 %v234_v10 }
  0x16   : > { %1272 = vmatmul.msk.f32.vlgmr.msra.gmra.mxu1 %vm249_vm1, %v225_v9 }
  0x1d   : > { %1264 = vmatmul.msk.f32.gmra.mxu0 %vm249_vm1, %v226_v11 }
  0x1e   : > { %1273 = vmatmul.msk.f32.gmra.mxu1 %vm249_vm1, %v226_v11 }
  0x25   : > { %1265 = vmatmul.msk.f32.gmra.mxu0 %vm249_vm1, %v227_v12 }
  0x26   : > { %1274 = vmatmul.msk.f32.gmra.mxu1 %vm249_vm1, %v227_v12 }
  0x2d   : > { %1266 = vmatmul.msk.f32.gmra.mxu0 %vm249_vm1, %v228_v13 }
  0x2e   : > { %1275 = vmatmul.msk.f32.gmra.mxu1 %vm249_vm1, %v228_v13 }
  0x35   : > { %1267 = vmatmul.msk.f32.gmra.mxu0 %vm249_vm1, %v229_v14 }
  0x36   : > { %1276 = vmatmul.msk.f32.gmra.mxu1 %vm249_vm1, %v229_v14 }
  0x3d   : > { %1268 = vmatmul.msk.f32.gmra.mxu0 %vm249_vm1, %v230_v15 }
  0x3e   : > { %1277 = vmatmul.msk.f32.gmra.mxu1 %vm249_vm1, %v230_v15 }
  0x45   : > { %1269 = vmatmul.msk.f32.gmra.mxu0 %vm249_vm1, %v231_v16 }
  0x46   : > { %1278 = vmatmul.msk.f32.gmra.mxu1 %vm249_vm1, %v231_v16 }
  0x4d   : > { %1270 = vmatmul.msk.f32.gmra.mxu0 %vm249_vm1, %v232_v17 }
  0x4e   : > { %1279 = vmatmul.msk.f32.gmra.mxu1 %vm249_vm1, %v232_v17 }
  0x92   : > { %v298_v21 = vpop.f32.mrf.mxu0 }
  0x93   : > { %v299_v22 = vadd.f32 %v298_v21, %v245_v19  ;;  %v339_v23 = vpop.f32.mrf.mxu1 }
  0x94   : > { %v1573_v24 = vadd.f32 %v339_v23, %v246_v20 }
  0x95   : > { %vm363_vm2 = vcmp.gt.f32.partialorder %v299_v22, 0.0  ;;  %v371_v25 = vmul.f32 0.2, %v299_v22 }
  0x97   : > { %v1575_v26 = vsel %vm363_vm2, %v299_v22, %v371_v25 }
  0x9a   : > { %v301_v27 = vpop.f32.mrf.mxu0 }
  0x9b   : > { %v302_v28 = vadd.f32 %v301_v27, %v245_v19  ;;  %v342_v29 = vpop.f32.mrf.mxu1 }
  0x9c   : > { %v1577_v30 = vadd.f32 %v342_v29, %v246_v20 }
  0x9d   : > { %vm364_vm3 = vcmp.gt.f32.partialorder %v302_v28, 0.0  ;;  %v372_v31 = vmul.f32 0.2, %v302_v28 }
  0x9f   : > { %v1579_v32 = vsel %vm364_vm3, %v302_v28, %v372_v31 }
  0xa2   : > { %v304_v33 = vpop.f32.mrf.mxu0 }
  0xa3   : > { %v305_v34 = vadd.f32 %v304_v33, %v245_v19  ;;  %v345_v35 = vpop.f32.mrf.mxu1 }
  0xa4   : > { %v1581_v36 = vadd.f32 %v345_v35, %v246_v20 }
  0xa5   : > { %vm365_vm4 = vcmp.gt.f32.partialorder %v305_v34, 0.0  ;;  %v373_v37 = vmul.f32 0.2, %v305_v34 }
  0xa7   : > { %v1583_v38 = vsel %vm365_vm4, %v305_v34, %v373_v37 }
  0xaa   : > { %v307_v39 = vpop.f32.mrf.mxu0 }
  0xab   : > { %v308_v40 = vadd.f32 %v307_v39, %v245_v19  ;;  %v348_v41 = vpop.f32.mrf.mxu1 }
  0xac   : > { %v1585_v42 = vadd.f32 %v348_v41, %v246_v20 }
  0xad   : > { %vm366_vm5 = vcmp.gt.f32.partialorder %v308_v40, 0.0  ;;  %v374_v43 = vmul.f32 0.2, %v308_v40 }
  0xaf   : > { %v1587_v44 = vsel %vm366_vm5, %v308_v40, %v374_v43 }
  0xb2   : > { %v310_v45 = vpop.f32.mrf.mxu0 }
  0xb3   : > { %v311_v46 = vadd.f32 %v310_v45, %v245_v19  ;;  %v351_v47 = vpop.f32.mrf.mxu1 }
  0xb4   : > { %v1589_v48 = vadd.f32 %v351_v47, %v246_v20 }
  0xb5   : > { %vm367_vm6 = vcmp.gt.f32.partialorder %v311_v46, 0.0  ;;  %v375_v49 = vmul.f32 0.2, %v311_v46 }
  0xb7   : > { %v1591_v50 = vsel %vm367_vm6, %v311_v46, %v375_v49 }
  0xba   : > { %v313_v51 = vpop.f32.mrf.mxu0 }
  0xbb   : > { %v314_v52 = vadd.f32 %v313_v51, %v245_v19  ;;  %v354_v53 = vpop.f32.mrf.mxu1 }
  0xbc   : > { %v1593_v54 = vadd.f32 %v354_v53, %v246_v20 }
  0xbd   : > { %vm368_vm7 = vcmp.gt.f32.partialorder %v314_v52, 0.0  ;;  %v376_v55 = vmul.f32 0.2, %v314_v52 }
  0xbf   : > { %v1595_v56 = vsel %vm368_vm7, %v314_v52, %v376_v55 }
  0xc2   : > { %v316_v57 = vpop.f32.mrf.mxu0 }
  0xc3   : > { %v317_v58 = vadd.f32 %v316_v57, %v245_v19  ;;  %v357_v59 = vpop.f32.mrf.mxu1 }
  0xc4   : > { %v1597_v60 = vadd.f32 %v357_v59, %v246_v20 }
  0xc5   : > { %vm369_vm8 = vcmp.gt.f32.partialorder %v317_v58, 0.0  ;;  %v377_v61 = vmul.f32 0.2, %v317_v58 }
  0xc7   : > { %v1599_v62 = vsel %vm369_vm8, %v317_v58, %v377_v61 }
  0xca   : > { %v319_v63 = vpop.f32.mrf.mxu0 }
  0xcb   : > { %v320_v0 = vadd.f32 %v319_v63, %v245_v19  ;;  %v360_v1 = vpop.f32.mrf.mxu1  ;;  %390 = sbr.rel (%p1280_p4) target bundleno = 213 (0xd5), region = 44 }
  0xcc   : > { %v1601_v2 = vadd.f32 %v360_v1, %v246_v20 }
  0xcd   : > { %vm370_vm9 = vcmp.gt.f32.partialorder %v320_v0, 0.0  ;;  %v378_v3 = vmul.f32 0.2, %v320_v0 }
  0xce   : > { %2484 = vst [vmem:[#allocation3_spill] sm:$0xff] %v1601_v2 }
  0xcf   : > { %v1603_v4 = vsel %vm370_vm9, %v320_v0, %v378_v3 }
  0xd0   : > { %v1463_v5 = vmov 0.0  }
  0xd1   : > { %391 = vst [vmem:[#allocation2] sm:$0xff] %v1463_v5 }
  0xd2   : > { %392 = vst [vmem:[#allocation2 + $0x8] sm:$0xff] %v1463_v5 }
  0xd3   : > { %393 = vst [vmem:[#allocation2 + $0x50] sm:$0xff] %v1463_v5 }
  0xd4   : > { %394 = vst [vmem:[#allocation2 + $0x58] sm:$0xff] %v1463_v5 }
  0xd5 PF: > { %v1296_v6 = vld [vmem:[%s2481_s3 + $0x1f8] sm:$0xff]  ;;  %v1295_v7 = vld [vmem:[%s2481_s3 + $0x1f0] sm:$0xff]  ;;  %395 = vst [vmem:[#allocation2 + $0x10] sm:$0xff] %v1575_v26  ;;  %v1294_v8 = vld [vmem:[%s2481_s3 + $0x1e8] sm:$0xff]  ;;  %v403_v21 = vlaneseq }
  0xd6   : > { %679 = vmatpush.msra.mxu2 %v1296_v6  ;;  %1429 = vmatpush.msra.mxu3 %v1296_v6  ;;  %398 = vst [vmem:[#allocation2 + $0x28] sm:$0xff] %v1587_v44  ;;  %v1293_v9 = vld [vmem:[%s2481_s3 + $0x1e0] sm:$0xff]  ;;  %v1292_v10 = vld [vmem:[%s2481_s3 + $0x1d8] sm:$0xff]  ;;  %v1291_v12 = vld [vmem:[%s2481_s3 + $0x1d0] sm:$0xff] }
  0xd7   : > { %399 = vst [vmem:[#allocation2 + $0x30] sm:$0xff] %v1591_v50  ;;  %v1328_v11 = vld [vmem:[%s2481_s3 + $0x2f8] sm:$0xff]  ;;  %v1327_v14 = vld [vmem:[%s2481_s3 + $0x2f0] sm:$0xff]  ;;  %v1290_v16 = vld [vmem:[%s2481_s3 + $0x1c8] sm:$0xff]  ;;  %v1677_v31 = vshrl.u32 %v403_v21, 7 }
  0xd8   : > { %680 = vmatpush.msra.mxu2 %v1295_v7  ;;  %1430 = vmatpush.msra.mxu3 %v1295_v7  ;;  %396 = vst [vmem:[#allocation2 + $0x18] sm:$0xff] %v1579_v32  ;;  %v579_v13 = vld [vmem:[%s2481_s3 + $0x78] sm:$0xff]  ;;  %v578_v15 = vld [vmem:[%s2481_s3 + $0x70] sm:$0xff]  ;;  %v1326_v17 = vld [vmem:[%s2481_s3 + $0x2e8] sm:$0xff] }
  0xd9   : > { %400 = vst [vmem:[#allocation2 + $0x38] sm:$0xff] %v1595_v56  ;;  %761 = vmatpush.msrb.mxu0 %v1328_v11  ;;  %802 = vmatpush.msrb.mxu1 %v579_v13  ;;  %v577_v18 = vld [vmem:[%s2481_s3 + $0x68] sm:$0xff]  ;;  %v1289_v19 = vld [vmem:[%s2481_s3 + $0x1c0] sm:$0xff]  ;;  %v1288_v23 = vld [vmem:[%s2481_s3 + $0x1b8] sm:$0xff]  ;;  %v1698_v41 = vadd.s32 32, %v1677_v31  ;;  %v416_v52 = vand.u32 7, %v1677_v31 }
  0xda   : > { %681 = vmatpush.msra.mxu2 %v1294_v8  ;;  %1431 = vmatpush.msra.mxu3 %v1294_v8  ;;  %397 = vst [vmem:[#allocation2 + $0x20] sm:$0xff] %v1583_v38  ;;  %v1325_v20 = vld [vmem:[%s2481_s3 + $0x2e0] sm:$0xff]  ;;  %v1324_v25 = vld [vmem:[%s2481_s3 + $0x2d8] sm:$0xff]  ;;  %v1323_v28 = vld [vmem:[%s2481_s3 + $0x2d0] sm:$0xff]  ;;  %v1755_v6 = vadd.s32 8, %v1677_v31  ;;  %v1758_v7 = vadd.s32 40, %v1677_v31 }
  0xdb   : > { %401 = vst [vmem:[#allocation2 + $0x40] sm:$0xff] %v1599_v62  ;;  %762 = vmatpush.msrb.mxu0 %v1327_v14  ;;  %803 = vmatpush.msrb.mxu1 %v578_v15  ;;  %v576_v22 = vld [vmem:[%s2481_s3 + $0x60] sm:$0xff]  ;;  %v575_v27 = vld [vmem:[%s2481_s3 + $0x58] sm:$0xff]  ;;  %v1287_v29 = vld [vmem:[%s2481_s3 + $0x1b0] sm:$0xff]  ;;  %v444_v53 = vand.u32 7, %v1698_v41  ;;  %vm1740_vm10 = vcmp.gt.s32.totalorder %v416_v52, 0 }
  0xdc   : > { %682 = vmatpush.msra.mxu2 %v1293_v9  ;;  %1432 = vmatpush.msra.mxu3 %v1293_v9  ;;  %402 = vst [vmem:[#allocation2 + $0x48] sm:$0xff] %v1603_v4  ;;  %v574_v33 = vld [vmem:[%s2481_s3 + $0x50] sm:$0xff]  ;;  %v1322_v34 = vld [vmem:[%s2481_s3 + $0x2c8] sm:$0xff]  ;;  %v1321_v39 = vld [vmem:[%s2481_s3 + $0x2c0] sm:$0xff]  ;;  %v423_v14 = vand.u32 7, %v1755_v6  ;;  %v451_v15 = vand.u32 7, %v1758_v7 }
  0xdd   : > { %763 = vmatpush.msrb.mxu0 %v1326_v17  ;;  %804 = vmatpush.msrb.mxu1 %v577_v18  ;;  %v1286_v35 = vld [vmem:[%s2481_s3 + $0x1a8] sm:$0xff]  ;;  %v1285_v40 = vld [vmem:[%s2481_s3 + $0x1a0] sm:$0xff]  ;;  %v1320_v45 = vld [vmem:[%s2481_s3 + $0x2b8] sm:$0xff]  ;;  %vm1748_vm11 = vcmp.gt.s32.totalorder %v444_v53, 0  ;;  %vm1863_vm14 = vcmp.lt.s32.totalorder %v416_v52, 7  ;;  %vm2117_vm6 = vcmp.lt.s32.totalorder %v444_v53, 7 }
  0xde   : > { %683 = vmatpush.msra.mxu2 %v1292_v10  ;;  %1433 = vmatpush.msra.mxu3 %v1292_v10  ;;  %v573_v37 = vld [vmem:[%s2481_s3 + $0x48] sm:$0xff]  ;;  %v572_v43 = vld [vmem:[%s2481_s3 + $0x40] sm:$0xff]  ;;  %v1284_v46 = vld [vmem:[%s2481_s3 + $0x198] sm:$0xff]  ;;  %vm1812_vm12 = vcmp.gt.s32.totalorder %v423_v14, 0  ;;  %vm1820_vm13 = vcmp.gt.s32.totalorder %v451_v15, 0  ;;  %vm1942_vm1 = vcmp.lt.s32.totalorder %v423_v14, 7 }
  0xdf   : > { %764 = vmatpush.msrb.mxu0 %v1325_v20  ;;  %805 = vmatpush.msrb.mxu1 %v576_v22  ;;  %v571_v47 = vld [vmem:[%s2481_s3 + $0x38] sm:$0xff]  ;;  %v1319_v49 = vld [vmem:[%s2481_s3 + $0x2b0] sm:$0xff]  ;;  %v1318_v57 = vld [vmem:[%s2481_s3 + $0x2a8] sm:$0xff]  ;;  %vm2169_vm7 = vcmp.lt.s32.totalorder %v451_v15, 7 }
  0xe0   : > { %684 = vmatpush.msra.mxu2 %v1291_v12  ;;  %1434 = vmatpush.msra.mxu3 %v1291_v12  ;;  %v1283_v51 = vld [vmem:[%s2481_s3 + $0x190] sm:$0xff]  ;;  %v1282_v58 = vld [vmem:[%s2481_s3 + $0x188] sm:$0xff]  ;;  %v1317_v61 = vld [vmem:[%s2481_s3 + $0x2a0] sm:$0xff] }
  0xe1   : > { %765 = vmatpush.msrb.mxu0 %v1324_v25  ;;  %806 = vmatpush.msrb.mxu1 %v575_v27  ;;  %v570_v55 = vld [vmem:[%s2481_s3 + $0x30] sm:$0xff]  ;;  %v569_v59 = vld [vmem:[%s2481_s3 + $0x28] sm:$0xff]  ;;  %v1281_v63 = vld [vmem:[%s2481_s3 + $0x180] sm:$0xff] }
  0xe2   : > { %685 = vmatpush.msra.mxu2 %v1290_v16  ;;  %1435 = vmatpush.msra.mxu3 %v1290_v16  ;;  %v1744_v1 = vld [vmem:[#allocation2 + $0xf] sm:$0xff]  ;;  %v1312_v8 = vld [vmem:[%s2481_s3 + $0x278] sm:$0xff]  ;;  %v568_v10 = vld [vmem:[%s2481_s3 + $0x20] sm:$0xff] }
  0xe3   : > { %766 = vmatpush.msrb.mxu0 %v1323_v28  ;;  %807 = vmatpush.msrb.mxu1 %v574_v33  ;;  %v1752_v5 = vld [vmem:[#allocation2 + $0x2f] sm:$0xff]  ;;  %v595_v9 = vld [vmem:[%s2481_s3 + $0xf8] sm:$0xff]  ;;  %v1309_v22 = vld [vmem:[%s2481_s3 + $0x260] sm:$0xff]  ;;  %v1827_v33 = vadd.s32 16, %v1677_v31 }
  0xe4   : > { %686 = vmatpush.msra.mxu2 %v1289_v19  ;;  %1436 = vmatpush.msra.mxu3 %v1289_v19  ;;  %v1316_v11 = vld [vmem:[%s2481_s3 + $0x298] sm:$0xff]  ;;  %v1311_v12 = vld [vmem:[%s2481_s3 + $0x270] sm:$0xff]  ;;  %v1310_v18 = vld [vmem:[%s2481_s3 + $0x268] sm:$0xff] }
  0xe5   : > { %767 = vmatpush.msrb.mxu0 %v1322_v34  ;;  %808 = vmatpush.msrb.mxu1 %v573_v37  ;;  %v594_v13 = vld [vmem:[%s2481_s3 + $0xf0] sm:$0xff]  ;;  %v567_v16 = vld [vmem:[%s2481_s3 + $0x18] sm:$0xff]  ;;  %v593_v19 = vld [vmem:[%s2481_s3 + $0xe8] sm:$0xff]  ;;  %v1830_v34 = vadd.s32 48, %v1677_v31 }
  0xe6   : > { %687 = vmatpush.msra.mxu2 %v1288_v23  ;;  %1437 = vmatpush.msra.mxu3 %v1288_v23  ;;  %v1315_v17 = vld [vmem:[%s2481_s3 + $0x290] sm:$0xff]  ;;  %v1314_v21 = vld [vmem:[%s2481_s3 + $0x288] sm:$0xff]  ;;  %v592_v23 = vld [vmem:[%s2481_s3 + $0xe0] sm:$0xff] }
  0xe7   : > { %768 = vmatpush.msrb.mxu0 %v1321_v39  ;;  %809 = vmatpush.msrb.mxu1 %v572_v43  ;;  %v566_v20 = vld [vmem:[%s2481_s3 + $0x10] sm:$0xff]  ;;  %v591_v37 = vld [vmem:[%s2481_s3 + $0xd8] sm:$0xff]  ;;  %v565_v39 = vld [vmem:[%s2481_s3 + $0x8] sm:$0xff] }
  0xe8   : > { %688 = vmatpush.msra.mxu2 %v1287_v29  ;;  %1438 = vmatpush.msra.mxu3 %v1287_v29  ;;  %v1816_v27 = vld [vmem:[#allocation2 + $0x17] sm:$0xff]  ;;  %v1374_v6 = vld [vmem:[%s2481_s3 + $0x368] sm:$0xff]  ;;  %v1301_v14 = vld [vmem:[%s2481_s3 + $0x220] sm:$0xff] }
  0xe9   : > { %769 = vmatpush.msrb.mxu0 %v1320_v45  ;;  %810 = vmatpush.msrb.mxu1 %v571_v47  ;;  %v1824_v29 = vld [vmem:[#allocation2 + $0x37] sm:$0xff]  ;;  %v458_v47 = vand.u32 7, %v1830_v34  ;;  %v604_v53 = vld [vmem:[%s2481_s3 + $0x140] sm:$0xff]  ;;  %v1366_v7 = vld [vmem:[%s2481_s3 + $0x328] sm:$0xff] }
  0xea   : > { %689 = vmatpush.msra.mxu2 %v1286_v35  ;;  %1439 = vmatpush.msra.mxu3 %v1286_v35  ;;  %v1308_v35 = vld [vmem:[%s2481_s3 + $0x258] sm:$0xff]  ;;  %v1307_v43 = vld [vmem:[%s2481_s3 + $0x250] sm:$0xff]  ;;  %v600_v15 = vld [vmem:[%s2481_s3 + $0x120] sm:$0xff] }
  0xeb   : > { %770 = vmatpush.msrb.mxu0 %v1319_v49  ;;  %811 = vmatpush.msrb.mxu1 %v570_v55  ;;  %v590_v45 = vld [vmem:[%s2481_s3 + $0xd0] sm:$0xff]  ;;  %v564_v49 = vld [vmem:[%s2481_s3] sm:$0xff]  ;;  %v1376_v52 = vld [vmem:[%s2481_s3 + $0x378] sm:$0xff]  ;;  %vm1897_vm0 = vcmp.gt.s32.totalorder %v458_v47, 0  ;;  %vm2218_vm8 = vcmp.lt.s32.totalorder %v458_v47, 7 }
  0xec   : > { %690 = vmatpush.msra.mxu2 %v1285_v40  ;;  %1440 = vmatpush.msra.mxu3 %v1285_v40  ;;  %v1313_v40 = vld [vmem:[%s2481_s3 + $0x280] sm:$0xff]  ;;  %v1867_v55 = vld [vmem:[#allocation2 + $0x11] sm:$0xff]  ;;  %v597_v47 = vld [vmem:[%s2481_s3 + $0x108] sm:$0xff] }
  0xed   : > { %771 = vmatpush.msrb.mxu0 %v1318_v57  ;;  %812 = vmatpush.msrb.mxu1 %v569_v59  ;;  %v1306_v57 = vld [vmem:[%s2481_s3 + $0x248] sm:$0xff]  ;;  %v1368_v41 = vld [vmem:[%s2481_s3 + $0x338] sm:$0xff]  ;;  %v1395_v34 = vld [vmem:[%s2481_s3 + $0x410] sm:$0xff] }
  0xee   : > { %691 = vmatpush.msra.mxu2 %v1284_v46  ;;  %1441 = vmatpush.msra.mxu3 %v1284_v46  ;;  %v430_v46 = vand.u32 7, %v1827_v33  ;;  %v532_v59 = vld [vmem:[#allocation2 + $0x7] sm:$0xff]  ;;  %v1372_v33 = vld [vmem:[%s2481_s3 + $0x358] sm:$0xff] }
  0xef   : > { %772 = vmatpush.msrb.mxu0 %v1317_v61  ;;  %813 = vmatpush.msrb.mxu1 %v568_v10  ;;  %v1305_v61 = vld [vmem:[%s2481_s3 + $0x240] sm:$0xff]  ;;  %v548_v0 = vld [vmem:[#allocation2 + $0x9] sm:$0xff] }
  0xf0   : > { %692 = vmatpush.msra.mxu2 %v1283_v51  ;;  %1442 = vmatpush.msra.mxu3 %v1283_v51  ;;  %vm1889_vm15 = vcmp.gt.s32.totalorder %v430_v46, 0  ;;  %vm2014_vm4 = vcmp.lt.s32.totalorder %v430_v46, 7  ;;  %v1297_v46 = vld [vmem:[%s2481_s3 + $0x200] sm:$0xff] }
  0xf1   : > { %773 = vmatpush.msrb.mxu0 %v1316_v11  ;;  %814 = vmatpush.msrb.mxu1 %v567_v16  ;;  %v1901_v11 = vld [vmem:[#allocation2 + $0x3f] sm:$0xff] }
  0xf2   : > { %693 = vmatpush.msra.mxu2 %v1282_v58  ;;  %1443 = vmatpush.msra.mxu3 %v1282_v58  ;;  %v589_v58 = vld [vmem:[%s2481_s3 + $0xc8] sm:$0xff]  ;;  %v1304_v16 = vld [vmem:[%s2481_s3 + $0x238] sm:$0xff] }
  0xf3   : > { %774 = vmatpush.msrb.mxu0 %v1315_v17  ;;  %815 = vmatpush.msrb.mxu1 %v566_v20  ;;  %v587_v17 = vld [vmem:[%s2481_s3 + $0xb8] sm:$0xff]  ;;  %v586_v20 = vld [vmem:[%s2481_s3 + $0xb0] sm:$0xff] }
  0xf4   : > { %694 = vmatpush.msra.mxu2 %v1281_v63  ;;  %1444 = vmatpush.msra.mxu3 %v1281_v63  ;;  %v588_v63 = vld [vmem:[%s2481_s3 + $0xc0] sm:$0xff] }
  0xf5   : > { %1329 = vmatmul.msk.f32.vlgmr.msra.gmra.mxu2 %vm1740_vm10, %v1744_v1  ;;  %1333 = vmatmul.msk.f32.vlgmr.msra.gmra.mxu3 %vm1748_vm11, %v1752_v5 }
  0xf6   : > { %720 = vmatpush.msrb.mxu3 %v1312_v8  ;;  %843 = vmatpush.msrb.mxu2 %v595_v9  ;;  %v1893_v9 = vld [vmem:[#allocation2 + $0x1f] sm:$0xff] }
  0xf7   : > { %775 = vmatpush.msrb.mxu0 %v1314_v21  ;;  %816 = vmatpush.msrb.mxu1 %v565_v39  ;;  %v1302_v39 = vld [vmem:[%s2481_s3 + $0x228] sm:$0xff] }
  0xf8   : > { %721 = vmatpush.msrb.mxu3 %v1311_v12  ;;  %844 = vmatpush.msrb.mxu2 %v594_v13  ;;  %v1904_v12 = vadd.s32 24, %v1677_v31  ;;  %v1907_v13 = vadd.s32 56, %v1677_v31  ;;  %v1375_v31 = vld [vmem:[%s2481_s3 + $0x370] sm:$0xff] }
  0xf9   : > { %776 = vmatpush.msrb.mxu0 %v1313_v40  ;;  %817 = vmatpush.msrb.mxu1 %v564_v49  ;;  %v585_v40 = vld [vmem:[%s2481_s3 + $0xa8] sm:$0xff] }
  0xfa   : > { %722 = vmatpush.msrb.mxu3 %v1310_v18  ;;  %845 = vmatpush.msrb.mxu2 %v593_v19  ;;  %v1392_v18 = vld [vmem:[%s2481_s3 + $0x3f8] sm:$0xff]  ;;  %v1303_v19 = vld [vmem:[%s2481_s3 + $0x230] sm:$0xff]  ;;  %v437_v21 = vand.u32 7, %v1904_v12  ;;  %v1972_v49 = vld [vmem:[#allocation2 + $0x27] sm:$0xff] }
  0xfb   : > { %1337 = vmatmul.msk.f32.vlgmr.msrb.gmra.mxu0 %vm1863_vm14, %v1867_v55  ;;  %1345 = vmatmul.msk.f32.vlgmr.msrb.gmra.mxu1 %vm1740_vm10, %v532_v59  ;;  %v1300_v59 = vld [vmem:[%s2481_s3 + $0x218] sm:$0xff]  ;;  %v1370_v12 = vld [vmem:[%s2481_s3 + $0x348] sm:$0xff] }
  0xfc   : > { %723 = vmatpush.msrb.mxu3 %v1309_v22  ;;  %846 = vmatpush.msrb.mxu2 %v592_v23  ;;  %v465_v22 = vand.u32 7, %v1907_v13  ;;  %v1391_v23 = vld [vmem:[%s2481_s3 + $0x3f0] sm:$0xff]  ;;  %vm1968_vm2 = vcmp.gt.s32.totalorder %v437_v21, 0  ;;  %vm2065_vm5 = vcmp.lt.s32.totalorder %v437_v21, 7  ;;  %v608_v21 = vld [vmem:[%s2481_s3 + $0x160] sm:$0xff] }
  0xfd   : > { %1330 = vmatmul.msk.f32.gmra.mxu2 %vm1812_vm12, %v1816_v27  ;;  %1334 = vmatmul.msk.f32.gmra.mxu3 %vm1820_vm13, %v1824_v29 }
  0xfe   : > { %724 = vmatpush.msrb.mxu3 %v1308_v35  ;;  %847 = vmatpush.msrb.mxu2 %v591_v37  ;;  %v1946_v37 = vld [vmem:[#allocation2 + $0x19] sm:$0xff]  ;;  %vm1976_vm3 = vcmp.gt.s32.totalorder %v465_v22, 0  ;;  %vm2267_vm9 = vcmp.lt.s32.totalorder %v465_v22, 7 }
  0xff   : > { %1014 = vmatpush.msra.mxu0 %v1376_v52  ;;  %1055 = vmatpush.msra.mxu1 %v1392_v18  ;;  %v583_v52 = vld [vmem:[%s2481_s3 + $0x98] sm:$0xff] }
 0x100   : > { %725 = vmatpush.msrb.mxu3 %v1307_v43  ;;  %848 = vmatpush.msrb.mxu2 %v590_v45  ;;  %v584_v43 = vld [vmem:[%s2481_s3 + $0xa0] sm:$0xff] }
 0x101   : > { %1015 = vmatpush.msra.mxu0 %v1375_v31  ;;  %1056 = vmatpush.msra.mxu1 %v1391_v23  ;;  %v2018_v31 = vld [vmem:[#allocation2 + $0x21] sm:$0xff] }
 0x102   : > { %726 = vmatpush.msrb.mxu3 %v1306_v57  ;;  %849 = vmatpush.msrb.mxu2 %v589_v58  ;;  %v1980_v58 = vld [vmem:[#allocation2 + $0x47] sm:$0xff] }
 0x103   : > { %1338 = vmatmul.msk.f32.gmra.mxu0 %vm1942_vm1, %v1946_v37  ;;  %1346 = vmatmul.msk.f32.gmra.mxu1 %vm1812_vm12, %v1744_v1  ;;  %v1299_v1 = vld [vmem:[%s2481_s3 + $0x210] sm:$0xff]  ;;  %v580_v23 = vld [vmem:[%s2481_s3 + $0x80] sm:$0xff] }
 0x104   : > { %727 = vmatpush.msrb.mxu3 %v1305_v61  ;;  %850 = vmatpush.msrb.mxu2 %v588_v63  ;;  %v1390_v61 = vld [vmem:[%s2481_s3 + $0x3e8] sm:$0xff]  ;;  %v1373_v63 = vld [vmem:[%s2481_s3 + $0x360] sm:$0xff] }
 0x105   : > { %1331 = vmatmul.msk.f32.gmra.mxu2 %vm1889_vm15, %v1893_v9  ;;  %1335 = vmatmul.msk.f32.gmra.mxu3 %vm1897_vm0, %v1901_v11 }
 0x106   : > { %728 = vmatpush.msrb.mxu3 %v1304_v16  ;;  %851 = vmatpush.msrb.mxu2 %v587_v17  ;;  %v582_v16 = vld [vmem:[%s2481_s3 + $0x90] sm:$0xff]  ;;  %v1389_v17 = vld [vmem:[%s2481_s3 + $0x3e0] sm:$0xff] }
 0x107   : > { %1016 = vmatpush.msra.mxu0 %v1374_v6  ;;  %1057 = vmatpush.msra.mxu1 %v1390_v61  ;;  %v1408_v6 = vld [vmem:[%s2481_s3 + $0x478] sm:$0xff]  ;;  %v1387_v61 = vld [vmem:[%s2481_s3 + $0x3d0] sm:$0xff] }
 0x108   : > { %729 = vmatpush.msrb.mxu3 %v1303_v19  ;;  %852 = vmatpush.msrb.mxu2 %v586_v20  ;;  %v1298_v19 = vld [vmem:[%s2481_s3 + $0x208] sm:$0xff] }
 0x109   : > { %v581_v20 = vld [vmem:[%s2481_s3 + $0x88] sm:$0xff]  ;;  %1017 = vmatpush.msra.mxu0 %v1373_v63  ;;  %1058 = vmatpush.msra.mxu1 %v1389_v17 }
 0x10a   : > { %730 = vmatpush.msrb.mxu3 %v1302_v39  ;;  %853 = vmatpush.msrb.mxu2 %v585_v40  ;;  %v524_v39 = vld [vmem:[#allocation2 + $0x8] sm:$0xff]  ;;  %v611_v40 = vld [vmem:[%s2481_s3 + $0x178] sm:$0xff] }
 0x10b   : > { %1339 = vmatmul.msk.f32.gmra.mxu0 %vm2014_vm4, %v2018_v31  ;;  %1347 = vmatmul.msk.f32.gmra.mxu1 %vm1889_vm15, %v1816_v27  ;;  %v1406_v17 = vld [vmem:[%s2481_s3 + $0x468] sm:$0xff] }
 0x10c   : > { %731 = vmatpush.msrb.mxu3 %v1301_v14  ;;  %854 = vmatpush.msrb.mxu2 %v584_v43  ;;  %v1388_v14 = vld [vmem:[%s2481_s3 + $0x3d8] sm:$0xff]  ;;  %v1371_v43 = vld [vmem:[%s2481_s3 + $0x350] sm:$0xff] }
 0x10d   : > { %1332 = vmatmul.msk.f32.gmra.mxu2 %vm1968_vm2, %v1972_v49  ;;  %1336 = vmatmul.msk.f32.gmra.mxu3 %vm1976_vm3, %v1980_v58 }
 0x10e   : > { %732 = vmatpush.msrb.mxu3 %v1300_v59  ;;  %855 = vmatpush.msrb.mxu2 %v583_v52  ;;  %v610_v59 = vld [vmem:[%s2481_s3 + $0x170] sm:$0xff] }
 0x10f   : > { %1018 = vmatpush.msra.mxu0 %v1372_v33  ;;  %v1407_v52 = vld [vmem:[%s2481_s3 + $0x470] sm:$0xff]  ;;  %1059 = vmatpush.msra.mxu1 %v1388_v14  ;;  %v1404_v33 = vld [vmem:[%s2481_s3 + $0x458] sm:$0xff] }
 0x110   : > { %733 = vmatpush.msrb.mxu3 %v1299_v1  ;;  %856 = vmatpush.msrb.mxu2 %v582_v16  ;;  %v2069_v1 = vld [vmem:[#allocation2 + $0x29] sm:$0xff] }
 0x111   : > { %v609_v16 = vld [vmem:[%s2481_s3 + $0x168] sm:$0xff]  ;;  %1019 = vmatpush.msra.mxu0 %v1371_v43  ;;  %1060 = vmatpush.msra.mxu1 %v1387_v61  ;;  %v603_v61 = vld [vmem:[%s2481_s3 + $0x138] sm:$0xff] }
 0x112   : > { %734 = vmatpush.msrb.mxu3 %v1298_v19  ;;  %857 = vmatpush.msrb.mxu2 %v581_v20  ;;  %v1405_v19 = vld [vmem:[%s2481_s3 + $0x460] sm:$0xff]  ;;  %v607_v20 = vld [vmem:[%s2481_s3 + $0x158] sm:$0xff]  ;;  %v605_v43 = vld [vmem:[%s2481_s3 + $0x148] sm:$0xff] }
 0x113   : > { %1340 = vmatmul.msk.f32.gmra.mxu0 %vm2065_vm5, %v2069_v1  ;;  %1348 = vmatmul.msk.f32.gmra.mxu1 %vm1968_vm2, %v1893_v9 }
 0x114   : > { %735 = vmatpush.msrb.mxu3 %v1297_v46  ;;  %858 = vmatpush.msrb.mxu2 %v580_v23  ;;  %v1386_v46 = vld [vmem:[%s2481_s3 + $0x3c8] sm:$0xff]  ;;  %v1369_v23 = vld [vmem:[%s2481_s3 + $0x340] sm:$0xff] }
 0x115   : > { %736 = vmatmul.f32.vlgmr.msrb.gmra.mxu3 %v1575_v26  ;;  %859 = vmatmul.f32.vlgmr.msrb.gmra.mxu2 %v524_v39  ;;  %v606_v39 = vld [vmem:[%s2481_s3 + $0x150] sm:$0xff] }
 0x116   : > { %884 = vmatpush.msra.mxu3 %v611_v40  ;;  %1096 = vmatpush.msra.mxu2 %v1408_v6  ;;  %v1403_v40 = vld [vmem:[%s2481_s3 + $0x450] sm:$0xff]  ;;  %v1385_v6 = vld [vmem:[%s2481_s3 + $0x3c0] sm:$0xff] }
 0x117   : > { %1020 = vmatpush.msra.mxu0 %v1370_v12  ;;  %1061 = vmatpush.msra.mxu1 %v1386_v46  ;;  %v1367_v12 = vld [vmem:[%s2481_s3 + $0x330] sm:$0xff]  ;;  %v2173_v46 = vld [vmem:[#allocation2 + $0x39] sm:$0xff] }
 0x118   : > { %885 = vmatpush.msra.mxu3 %v610_v59  ;;  %1097 = vmatpush.msra.mxu2 %v1407_v52  ;;  %v1402_v59 = vld [vmem:[%s2481_s3 + $0x448] sm:$0xff]  ;;  %v1401_v52 = vld [vmem:[%s2481_s3 + $0x440] sm:$0xff] }
 0x119   : > { %1021 = vmatpush.msra.mxu0 %v1369_v23  ;;  %1062 = vmatpush.msra.mxu1 %v1385_v6  ;;  %v601_v23 = vld [vmem:[%s2481_s3 + $0x128] sm:$0xff]  ;;  %v1397_v6 = vld [vmem:[%s2481_s3 + $0x420] sm:$0xff] }
 0x11a   : > { %886 = vmatpush.msra.mxu3 %v609_v16  ;;  %1098 = vmatpush.msra.mxu2 %v1406_v17  ;;  %v1400_v16 = vld [vmem:[%s2481_s3 + $0x438] sm:$0xff] }
 0x11b   : > { %1349 = vmatmul.msk.f32.gmra.mxu1 %vm1748_vm11, %v1972_v49  ;;  %1022 = vmatpush.msra.mxu0 %v1368_v41  ;;  %v1384_v17 = vld [vmem:[%s2481_s3 + $0x3b8] sm:$0xff]  ;;  %v1381_v41 = vld [vmem:[%s2481_s3 + $0x3a0] sm:$0xff] }
 0x11c   : > { %887 = vmatpush.msra.mxu3 %v608_v21  ;;  %1099 = vmatpush.msra.mxu2 %v1405_v19  ;;  %v602_v21 = vld [vmem:[%s2481_s3 + $0x130] sm:$0xff] }
 0x11d   : > { %739 = vmatmul.f32.gmra.mxu3 %v1579_v32  ;;  %862 = vmatmul.f32.gmra.mxu2 %v1575_v26  ;;  %v2121_v26 = vld [vmem:[#allocation2 + $0x31] sm:$0xff] }
 0x11e   : > { %888 = vmatpush.msra.mxu3 %v607_v20  ;;  %1100 = vmatpush.msra.mxu2 %v1404_v33  ;;  %v1399_v19 = vld [vmem:[%s2481_s3 + $0x430] sm:$0xff] }
 0x11f   : > { %1341 = vmatmul.msk.f32.gmra.mxu0 %vm2117_vm6, %v2121_v26  ;;  %v1383_v20 = vld [vmem:[%s2481_s3 + $0x3b0] sm:$0xff]  ;;  %1063 = vmatpush.msra.mxu1 %v1384_v17  ;;  %v1380_v17 = vld [vmem:[%s2481_s3 + $0x398] sm:$0xff] }
 0x120   : > { %889 = vmatpush.msra.mxu3 %v606_v39  ;;  %1101 = vmatpush.msra.mxu2 %v1403_v40  ;;  %v1398_v39 = vld [vmem:[%s2481_s3 + $0x428] sm:$0xff] }
 0x121   : > { %1023 = vmatpush.msra.mxu0 %v1367_v12  ;;  %1064 = vmatpush.msra.mxu1 %v1383_v20  ;;  %v1382_v40 = vld [vmem:[%s2481_s3 + $0x3a8] sm:$0xff]  ;;  %v1364_v12 = vld [vmem:[%s2481_s3 + $0x318] sm:$0xff] }
 0x122   : > { %890 = vmatpush.msra.mxu3 %v605_v43  ;;  %1102 = vmatpush.msra.mxu2 %v1402_v59  ;;  %v599_v43 = vld [vmem:[%s2481_s3 + $0x118] sm:$0xff]  ;;  %v1365_v59 = vld [vmem:[%s2481_s3 + $0x320] sm:$0xff]  ;;  %v1394_v20 = vld [vmem:[%s2481_s3 + $0x408] sm:$0xff] }
 0x123   : > { %1350 = vmatmul.msk.f32.gmra.mxu1 %vm1820_vm13, %v1752_v5  ;;  %1024 = vmatpush.msra.mxu0 %v1366_v7  ;;  %v1378_v7 = vld [vmem:[%s2481_s3 + $0x388] sm:$0xff] }
 0x124   : > { %891 = vmatpush.msra.mxu3 %v604_v53  ;;  %1103 = vmatpush.msra.mxu2 %v1401_v52  ;;  %v1396_v53 = vld [vmem:[%s2481_s3 + $0x418] sm:$0xff]  ;;  %v598_v52 = vld [vmem:[%s2481_s3 + $0x110] sm:$0xff] }
 0x125   : > { %742 = vmatmul.f32.gmra.mxu3 %v1583_v38  ;;  %865 = vmatmul.f32.gmra.mxu2 %v1579_v32 }
 0x126   : > { %892 = vmatpush.msra.mxu3 %v603_v61  ;;  %1104 = vmatpush.msra.mxu2 %v1400_v16  ;;  %v2222_v16 = vld [vmem:[#allocation2 + $0x41] sm:$0xff] }
 0x127   : > { %1342 = vmatmul.msk.f32.gmra.mxu0 %vm2169_vm7, %v2173_v46  ;;  %1065 = vmatpush.msra.mxu1 %v1382_v40 }
 0x128   : > { %893 = vmatpush.msra.mxu3 %v602_v21  ;;  %1105 = vmatpush.msra.mxu2 %v1399_v19  ;;  %v1363_v21 = vld [vmem:[%s2481_s3 + $0x310] sm:$0xff] }
 0x129   : > { %1025 = vmatpush.msra.mxu0 %v1365_v59  ;;  %1066 = vmatpush.msra.mxu1 %v1381_v41  ;;  %v1379_v19 = vld [vmem:[%s2481_s3 + $0x390] sm:$0xff]  ;;  %v1361_v59 = vld [vmem:[%s2481_s3 + $0x300] sm:$0xff] }
 0x12a   : > { %894 = vmatpush.msra.mxu3 %v601_v23  ;;  %1106 = vmatpush.msra.mxu2 %v1398_v39  ;;  %v596_v23 = vld [vmem:[%s2481_s3 + $0x100] sm:$0xff]  ;;  %v1362_v39 = vld [vmem:[%s2481_s3 + $0x308] sm:$0xff] }
 0x12b   : > { %1067 = vmatpush.msra.mxu1 %v1380_v17  ;;  %1026 = vmatpush.msra.mxu0 %v1364_v12 }
 0x12c   : > { %895 = vmatpush.msra.mxu3 %v600_v15  ;;  %1107 = vmatpush.msra.mxu2 %v1397_v6  ;;  %v1393_v15 = vld [vmem:[%s2481_s3 + $0x400] sm:$0xff]  ;;  %v621_v6 = vld [vmem:[#allocation2 + $0x49] sm:$0xff] }
 0x12d   : > { %745 = vmatmul.f32.gmra.mxu3 %v1587_v44  ;;  %868 = vmatmul.f32.gmra.mxu2 %v1583_v38 }
 0x12e   : > { %896 = vmatpush.msra.mxu3 %v599_v43  ;;  %1108 = vmatpush.msra.mxu2 %v1396_v53  ;;  %v1377_v43 = vld [vmem:[%s2481_s3 + $0x380] sm:$0xff] }
 0x12f   : > { %1343 = vmatmul.msk.f32.gmra.mxu0 %vm2218_vm8, %v2222_v16  ;;  %1351 = vmatmul.msk.f32.gmra.mxu1 %vm1897_vm0, %v1824_v29 }
 0x130   : > { %897 = vmatpush.msra.mxu3 %v598_v52  ;;  %1109 = vmatpush.msra.mxu2 %v1395_v34 }
 0x131   : > { %1027 = vmatpush.msra.mxu0 %v1363_v21  ;;  %1068 = vmatpush.msra.mxu1 %v1379_v19 }
 0x132   : > { %898 = vmatpush.msra.mxu3 %v597_v47  ;;  %1110 = vmatpush.msra.mxu2 %v1394_v20 }
 0x133   : > { %1028 = vmatpush.msra.mxu0 %v1362_v39  ;;  %1069 = vmatpush.msra.mxu1 %v1378_v7 }
 0x134   : > { %899 = vmatpush.msra.mxu3 %v596_v23  ;;  %1111 = vmatpush.msra.mxu2 %v1393_v15 }
 0x135   : > { %748 = vmatmul.f32.gmra.mxu3 %v1591_v50  ;;  %871 = vmatmul.f32.gmra.mxu2 %v1587_v44 }
 0x136   : > { %1070 = vmatpush.msra.mxu1 %v1377_v43  ;;  %1029 = vmatpush.msra.mxu0 %v1361_v59 }
 0x137   : > { %1344 = vmatmul.msk.f32.gmra.mxu0 %vm2267_vm9, %v621_v6  ;;  %1352 = vmatmul.msk.f32.gmra.mxu1 %vm1976_vm3, %v1901_v11 }
 0x13d   : > { %751 = vmatmul.f32.gmra.mxu3 %v1595_v56  ;;  %874 = vmatmul.f32.gmra.mxu2 %v1591_v50 }
 0x13f   : > { %1409 = vmatmul.msk.f32.vlgmr.msra.gmra.mxu0 %vm1740_vm10, %v1816_v27  ;;  %1071 = vmatmul.f32.vlgmr.msra.gmra.mxu1 %v1579_v32  ;;  %v940_v32 = vld [vmem:[#allocation2 + $0x4f] sm:$0xff] }
 0x145   : > { %754 = vmatmul.f32.gmra.mxu3 %v1599_v62  ;;  %877 = vmatmul.f32.gmra.mxu2 %v1595_v56 }
 0x147   : > { %1410 = vmatmul.msk.f32.gmra.mxu0 %vm1812_vm12, %v1893_v9  ;;  %1074 = vmatmul.f32.gmra.mxu1 %v1583_v38 }
 0x14d   : > { %757 = vmatmul.f32.gmra.mxu3 %v1603_v4  ;;  %880 = vmatmul.f32.gmra.mxu2 %v1599_v62 }
 0x14f   : > { %1411 = vmatmul.msk.f32.gmra.mxu0 %vm1889_vm15, %v1972_v49  ;;  %1077 = vmatmul.f32.gmra.mxu1 %v1587_v44 }
 0x155   : > { %1353 = vmatmul.msk.f32.vlgmr.msra.gmra.mxu3 %vm1863_vm14, %v548_v0  ;;  %1417 = vmatmul.msk.f32.vlgmr.msra.gmra.mxu2 %vm1863_vm14, %v1946_v37 }
 0x157   : > { %1412 = vmatmul.msk.f32.gmra.mxu0 %vm1968_vm2, %v1752_v5  ;;  %1080 = vmatmul.f32.gmra.mxu1 %v1591_v50  ;;  %v932_v50 = vld [vmem:[#allocation2 + $0x50] sm:$0xff] }
 0x15d   : > { %1354 = vmatmul.msk.f32.gmra.mxu3 %vm1942_vm1, %v1867_v55  ;;  %1418 = vmatmul.msk.f32.gmra.mxu2 %vm1942_vm1, %v2018_v31 }
 0x15f   : > { %1413 = vmatmul.msk.f32.gmra.mxu0 %vm1748_vm11, %v1824_v29  ;;  %1083 = vmatmul.f32.gmra.mxu1 %v1595_v56  ;;  %v956_v29 = vld [vmem:[#allocation2 + $0x51] sm:$0xff]  ;;  %vm1189_vm11 = vcmask 64512  }
 0x165   : > { %1355 = vmatmul.msk.f32.gmra.mxu3 %vm2014_vm4, %v1946_v37  ;;  %1419 = vmatmul.msk.f32.gmra.mxu2 %vm2014_vm4, %v2069_v1 }
 0x167   : > { %1414 = vmatmul.msk.f32.gmra.mxu0 %vm1820_vm13, %v1901_v11  ;;  %1086 = vmatmul.f32.gmra.mxu1 %v1599_v62 }
 0x16d   : > { %1356 = vmatmul.msk.f32.gmra.mxu3 %vm2065_vm5, %v2018_v31  ;;  %1420 = vmatmul.msk.f32.gmra.mxu2 %vm2065_vm5, %v2121_v26 }
 0x16f   : > { %1415 = vmatmul.msk.f32.gmra.mxu0 %vm1897_vm0, %v1980_v58  ;;  %1089 = vmatmul.f32.gmra.mxu1 %v1603_v4 }
 0x175   : > { %1357 = vmatmul.msk.f32.gmra.mxu3 %vm2117_vm6, %v2069_v1  ;;  %1421 = vmatmul.msk.f32.gmra.mxu2 %vm2117_vm6, %v2173_v46 }
 0x177   : > { %1416 = vmatmul.msk.f32.gmra.mxu0 %vm1976_vm3, %v940_v32  ;;  %1092 = vmatmul.f32.gmra.mxu1 %v932_v50 }
 0x178   : > { %v696_v38 = vpop.f32.mrf.mxu2  ;;  %v2345_v44 = vpop.f32.mrf.mxu3 }
 0x179   : > { %v778_v56 = vpop.f32.mrf.mxu0  ;;  %v819_v3 = vpop.f32.mrf.mxu1 }
 0x17d   : > { %1358 = vmatmul.msk.f32.gmra.mxu3 %vm2169_vm7, %v2121_v26  ;;  %1422 = vmatmul.msk.f32.gmra.mxu2 %vm2169_vm7, %v2222_v16 }
 0x180   : > { %v699_v62 = vpop.f32.mrf.mxu2  ;;  %v2355_v4 = vpop.f32.mrf.mxu3 }
 0x181   : > { %v781_v5 = vpop.f32.mrf.mxu0  ;;  %v822_v28 = vpop.f32.mrf.mxu1 }
 0x185   : > { %1359 = vmatmul.msk.f32.gmra.mxu3 %vm2218_vm8, %v2173_v46  ;;  %1423 = vmatmul.msk.f32.gmra.mxu2 %vm2218_vm8, %v621_v6 }
 0x188   : > { %v702_v25 = vpop.f32.mrf.mxu2  ;;  %v2362_v27 = vpop.f32.mrf.mxu3 }
 0x189   : > { %v784_v51 = vpop.f32.mrf.mxu0  ;;  %v2373_v9 = vpop.f32.mrf.mxu1 }
 0x18d   : > { %1360 = vmatmul.msk.f32.gmra.mxu3 %vm2267_vm9, %v2222_v16  ;;  %1424 = vmatmul.msk.f32.gmra.mxu2 %vm2267_vm9, %v956_v29 }
 0x190   : > { %v2369_v55 = vpop.f32.mrf.mxu2  ;;  %v2371_v8 = vpop.f32.mrf.mxu3 }
 0x191   : > { %v2375_v10 = vpop.f32.mrf.mxu0  ;;  %v2377_v22 = vpop.f32.mrf.mxu1 }
 0x198   : > { %v737_v11 = vpop.f32.mrf.mxu3  ;;  %v860_v13 = vpop.f32.mrf.mxu2 }
 0x199   : > { %v2381_v49 = vpop.f32.mrf.mxu1  ;;  %v738_v47 = vadd.f32 %v737_v11, %v696_v38  ;;  %v2416_v38 = vld [vmem:[%s2482_s4] ss:$0 sm:$0xff] }
 0x19b   : > { %v779_v20 = vadd.f32 %v778_v56, %v738_v47 }
 0x19c   : > { %v2379_v35 = vpop.f32.mrf.mxu0 }
 0x19d   : > { %v820_v7 = vadd.f32 %v819_v3, %v779_v20 }
 0x19f   : > { %v861_v6 = vadd.f32 %v860_v13, %v820_v7 }
 0x1a0   : > { %v740_v37 = vpop.f32.mrf.mxu3  ;;  %v863_v45 = vpop.f32.mrf.mxu2 }
 0x1a1   : > { %v2385_v31 = vpop.f32.mrf.mxu1  ;;  %v741_v15 = vadd.f32 %v740_v37, %v699_v62 }
 0x1a3   : > { %v782_v43 = vadd.f32 %v781_v5, %v741_v15 }
 0x1a4   : > { %v2383_v57 = vpop.f32.mrf.mxu0 }
 0x1a5   : > { %v823_v56 = vadd.f32 %v822_v28, %v782_v43 }
 0x1a7   : > { %v864_v37 = vadd.f32 %v863_v45, %v823_v56 }
 0x1a8   : > { %v743_v58 = vpop.f32.mrf.mxu3  ;;  %v866_v18 = vpop.f32.mrf.mxu2 }
 0x1a9   : > { %v744_v11 = vadd.f32 %v743_v58, %v702_v25 }
 0x1ab   : > { %v785_v5 = vadd.f32 %v784_v51, %v744_v11 }
 0x1ac   : > { %v2387_v63 = vpop.f32.mrf.mxu0  ;;  %v2391_v26 = vpop.f32.mrf.mxu1 }
 0x1b0   : > { %v746_v1 = vpop.f32.mrf.mxu3  ;;  %v2389_v14 = vpop.f32.mrf.mxu2 }
 0x1b1   : > { %v747_v25 = vadd.f32 %v746_v1, %v2369_v55 }
 0x1b4   : > { %v2397_v41 = vpop.f32.mrf.mxu0  ;;  %v2399_v53 = vpop.f32.mrf.mxu1 }
 0x1b8   : > { %v2393_v33 = vpop.f32.mrf.mxu3  ;;  %v2395_v46 = vpop.f32.mrf.mxu2 }
 0x1b9   : > { %v750_v1 = vadd.f32 %v2393_v33, %v2345_v44 }
 0x1bc   : > { %v1031_v16 = vpop.f32.mrf.mxu0  ;;  %v1072_v17 = vpop.f32.mrf.mxu1 }
 0x1bd   : > { %v1073_v40 = vadd.f32 %v1072_v17, %v1031_v16 }
 0x1c0   : > { %v2401_v52 = vpop.f32.mrf.mxu3  ;;  %v2403_v61 = vpop.f32.mrf.mxu2 }
 0x1c4   : > { %v1034_v21 = vpop.f32.mrf.mxu0  ;;  %v1075_v19 = vpop.f32.mrf.mxu1 }
 0x1c5   : > { %v1076_v62 = vadd.f32 %v1075_v19, %v1034_v21  ;;  %v788_v19 = vadd.f32 %v2375_v10, %v747_v25 }
 0x1c7   : > { %v829_v55 = vadd.f32 %v2377_v22, %v788_v19 }
 0x1c8   : > { %v2405_v12 = vpop.f32.mrf.mxu3  ;;  %v2407_v34 = vpop.f32.mrf.mxu2 }
 0x1cc   : > { %v1037_v59 = vpop.f32.mrf.mxu0  ;;  %v1078_v0 = vpop.f32.mrf.mxu1 }
 0x1cd   : > { %v1079_v45 = vadd.f32 %v1078_v0, %v1037_v59 }
 0x1d0   : > { %v2409_v23 = vpop.f32.mrf.mxu3  ;;  %v2411_v39 = vpop.f32.mrf.mxu2 }
 0x1d8   : > { %v901_v32 = vpop.f32.mrf.mxu3  ;;  %v1113_v50 = vpop.f32.mrf.mxu2 }
 0x1d9   : > { %v902_v29 = vadd.f32 %v901_v32, %v861_v6  ;;  %v1114_v2 = vadd.f32 %v1113_v50, %v1073_v40  ;;  %v1040_v40 = vpop.f32.mrf.mxu0  ;;  %v1081_v6 = vpop.f32.mrf.mxu1 }
 0x1db   : > { %v1137_v47 = vadd.f32 %v1114_v2, %v902_v29  ;;  %v826_v2 = vadd.f32 %v2373_v9, %v785_v5 }
 0x1dd   : > { %v1149_v3 = vadd.f32 %v2416_v38, %v1137_v47  ;;  %v867_v21 = vadd.f32 %v866_v18, %v826_v2  ;;  %v1082_v18 = vadd.f32 %v1081_v6, %v1040_v40  ;;  %v870_v47 = vadd.f32 %v2389_v14, %v829_v55 }
 0x1df   : > { %vm1157_vm10 = vcmp.gt.f32.partialorder %v1149_v3, 0.0  ;;  %v1165_v13 = vmul.f32 0.2, %v1149_v3 }
 0x1e0   : > { %v904_v16 = vpop.f32.mrf.mxu3  ;;  %v1116_v17 = vpop.f32.mrf.mxu2 }
 0x1e1   : > { %v1173_v20 = vsel %vm1157_vm10, %v1149_v3, %v1165_v13  ;;  %v905_v7 = vadd.f32 %v904_v16, %v864_v37  ;;  %v1117_v15 = vadd.f32 %v1116_v17, %v1076_v62  ;;  %v1043_v59 = vpop.f32.mrf.mxu0  ;;  %v1084_v0 = vpop.f32.mrf.mxu1  ;;  %v791_v3 = vadd.f32 %v2379_v35, %v750_v1 }
 0x1e2   : > { %v1181_v28 = vadd.f32 %v1173_v20, %v1573_v24  ;;  %v753_v16 = vadd.f32 %v2401_v52, %v2355_v4  ;;  %v1085_v35 = vadd.f32 %v1084_v0, %v1043_v59 }
 0x1e3   : > { %v1138_v58 = vadd.f32 %v1117_v15, %v905_v7  ;;  %v832_v13 = vadd.f32 %v2381_v49, %v791_v3 }
 0x1e4   : > { %1190 = vst.msk [vmem:[%s1535_s16] sm:$0xff] %vm1189_vm11, %v1181_v28  ;;  %v794_v40 = vadd.f32 %v2383_v57, %v753_v16 }
 0x1e5   : > { %v1150_v51 = vadd.f32 %v2416_v38, %v1138_v58  ;;  %v873_v15 = vadd.f32 %v2395_v46, %v832_v13  ;;  %v756_v58 = vadd.f32 %v2405_v12, %v2362_v27 }
 0x1e6   : > { %v835_v25 = vadd.f32 %v2385_v31, %v794_v40 }
 0x1e7   : > { %vm1158_vm12 = vcmp.gt.f32.partialorder %v1150_v51, 0.0  ;;  %v1166_v43 = vmul.f32 0.2, %v1150_v51 }
 0x1e8   : > { %v907_v32 = vpop.f32.mrf.mxu3  ;;  %v1119_v50 = vpop.f32.mrf.mxu2 }
 0x1e9   : > { %v1174_v29 = vsel %vm1158_vm12, %v1150_v51, %v1166_v43  ;;  %v908_v24 = vadd.f32 %v907_v32, %v867_v21  ;;  %v1120_v56 = vadd.f32 %v1119_v50, %v1079_v45  ;;  %v1046_v20 = vpop.f32.mrf.mxu0  ;;  %v1087_v7 = vpop.f32.mrf.mxu1  ;;  %v876_v45 = vadd.f32 %v2403_v61, %v835_v25 }
 0x1ea   : > { %v1182_v9 = vadd.f32 %v1174_v29, %v1577_v30  ;;  %v1088_v57 = vadd.f32 %v1087_v7, %v1046_v20  ;;  %v797_v21 = vadd.f32 %v2387_v63, %v756_v58 }
 0x1eb   : > { %v1139_v11 = vadd.f32 %v1120_v56, %v908_v24  ;;  %v759_v56 = vadd.f32 %v2409_v23, %v2371_v8 }
 0x1ec   : > { %1191 = vst.msk [vmem:[%s1535_s16 + $0x8] sm:$0xff] %vm1189_vm11, %v1182_v9  ;;  %v838_v24 = vadd.f32 %v2391_v26, %v797_v21 }
 0x1ed   : > { %v1151_v10 = vadd.f32 %v2416_v38, %v1139_v11  ;;  %v800_v1 = vadd.f32 %v2397_v41, %v759_v56 }
 0x1ee   : > { %v879_v55 = vadd.f32 %v2407_v34, %v838_v24 }
 0x1ef   : > { %vm1159_vm13 = vcmp.gt.f32.partialorder %v1151_v10, 0.0  ;;  %v1167_v30 = vmul.f32 0.2, %v1151_v10 }
 0x1f0   : > { %v910_v62 = vpop.f32.mrf.mxu3  ;;  %v1122_v22 = vpop.f32.mrf.mxu2 }
 0x1f1   : > { %v1175_v37 = vsel %vm1159_vm13, %v1151_v10, %v1167_v30  ;;  %v911_v5 = vadd.f32 %v910_v62, %v870_v47  ;;  %v1123_v44 = vadd.f32 %v1122_v22, %v1082_v18  ;;  %v1049_v43 = vpop.f32.mrf.mxu0  ;;  %v841_v47 = vadd.f32 %v2399_v53, %v800_v1 }
 0x1f2   : > { %v1183_v33 = vadd.f32 %v1175_v37, %v1581_v36 }
 0x1f3   : > { %v1140_v17 = vadd.f32 %v1123_v44, %v911_v5  ;;  %v882_v30 = vadd.f32 %v2411_v39, %v841_v47 }
 0x1f4   : > { %1192 = vst.msk [vmem:[%s1535_s16 + $0x10] sm:$0xff] %vm1189_vm11, %v1183_v33 }
 0x1f5   : > { %v1152_v14 = vadd.f32 %v2416_v38, %v1140_v17 }
 0x1f7   : > { %vm1160_vm14 = vcmp.gt.f32.partialorder %v1152_v14, 0.0  ;;  %v1168_v36 = vmul.f32 0.2, %v1152_v14 }
 0x1f8   : > { %v913_v6 = vpop.f32.mrf.mxu3  ;;  %v1125_v49 = vpop.f32.mrf.mxu2 }
 0x1f9   : > { %v1176_v28 = vsel %vm1160_vm14, %v1152_v14, %v1168_v36  ;;  %v914_v2 = vadd.f32 %v913_v6, %v873_v15  ;;  %v1126_v4 = vadd.f32 %v1125_v49, %v1085_v35  ;;  %v1052_v23 = vpop.f32.mrf.mxu0  ;;  %v2517_v14 = vld [vmem:[#allocation3_spill] sm:$0xff] }
 0x1fa   : > { %v1184_v52 = vadd.f32 %v1176_v28, %v1585_v42  ;;  %v1090_v42 = vpop.f32.mrf.mxu1 }
 0x1fb   : > { %v1141_v51 = vadd.f32 %v1126_v4, %v914_v2  ;;  %v1091_v61 = vadd.f32 %v1090_v42, %v1049_v43 }
 0x1fc   : > { %1193 = vst.msk [vmem:[%s1535_s16 + $0x18] sm:$0xff] %vm1189_vm11, %v1184_v52 }
 0x1fd   : > { %v1153_v46 = vadd.f32 %v2416_v38, %v1141_v51 }
 0x1ff   : > { %vm1161_vm15 = vcmp.gt.f32.partialorder %v1153_v46, 0.0  ;;  %v1169_v19 = vmul.f32 0.2, %v1153_v46 }
 0x200   : > { %v916_v32 = vpop.f32.mrf.mxu3  ;;  %v1128_v31 = vpop.f32.mrf.mxu2 }
 0x201   : > { %v1177_v50 = vsel %vm1161_vm15, %v1153_v46, %v1169_v19  ;;  %v917_v29 = vadd.f32 %v916_v32, %v876_v45  ;;  %v1129_v27 = vadd.f32 %v1128_v31, %v1088_v57 }
 0x202   : > { %v1185_v12 = vadd.f32 %v1177_v50, %v1589_v48  ;;  %v1093_v18 = vpop.f32.mrf.mxu1 }
 0x203   : > { %v1142_v9 = vadd.f32 %v1129_v27, %v917_v29  ;;  %v1094_v41 = vadd.f32 %v1093_v18, %v1052_v23 }
 0x204   : > { %1194 = vst.msk [vmem:[%s1535_s16 + $0x20] sm:$0xff] %vm1189_vm11, %v1185_v12 }
 0x205   : > { %v1154_v63 = vadd.f32 %v2416_v38, %v1142_v9 }
 0x207   : > { %vm1162_vm0 = vcmp.gt.f32.partialorder %v1154_v63, 0.0  ;;  %v1170_v11 = vmul.f32 0.2, %v1154_v63 }
 0x208   : > { %v919_v59 = vpop.f32.mrf.mxu3  ;;  %v1131_v48 = vpop.f32.mrf.mxu2 }
 0x209   : > { %v1178_v0 = vsel %vm1162_vm0, %v1154_v63, %v1170_v11  ;;  %v920_v26 = vadd.f32 %v919_v59, %v879_v55  ;;  %v1132_v10 = vadd.f32 %v1131_v48, %v1091_v61 }
 0x20a   : > { %v1186_v8 = vadd.f32 %v1178_v0, %v1593_v54 }
 0x20b   : > { %v1143_v3 = vadd.f32 %v1132_v10, %v920_v26 }
 0x20c   : > { %1195 = vst.msk [vmem:[%s1535_s16 + $0x28] sm:$0xff] %vm1189_vm11, %v1186_v8 }
 0x20d   : > { %v1155_v34 = vadd.f32 %v2416_v38, %v1143_v3 }
 0x20f   : > { %vm1163_vm1 = vcmp.gt.f32.partialorder %v1155_v34, 0.0  ;;  %v1171_v62 = vmul.f32 0.2, %v1155_v34 }
 0x210   : > { %v922_v22 = vpop.f32.mrf.mxu3  ;;  %v1134_v37 = vpop.f32.mrf.mxu2 }
 0x211   : > { %v1179_v5 = vsel %vm1163_vm1, %v1155_v34, %v1171_v62  ;;  %v923_v54 = vadd.f32 %v922_v22, %v882_v30  ;;  %v1135_v44 = vadd.f32 %v1134_v37, %v1094_v41 }
 0x212   : > { %v1187_v33 = vadd.f32 %v1179_v5, %v1597_v60 }
 0x213   : > { %v1144_v13 = vadd.f32 %v1135_v44, %v923_v54 }
 0x214   : > { %1196 = vst.msk [vmem:[%s1535_s16 + $0x30] sm:$0xff] %vm1189_vm11, %v1187_v33 }
 0x215   : > { %v1156_v53 = vadd.f32 %v2416_v38, %v1144_v13 }
 0x217   : > { %vm1164_vm2 = vcmp.gt.f32.partialorder %v1156_v53, 0.0  ;;  %v1172_v16 = vmul.f32 0.2, %v1156_v53 }
 0x219   : > { %v1180_v17 = vsel %vm1164_vm2, %v1156_v53, %v1172_v16 }
 0x21a   : > { %v1188_v39 = vadd.f32 %v1180_v17, %v2517_v14 }
 0x21c   : > { %1197 = vst.msk [vmem:[%s1535_s16 + $0x38] sm:$0xff] %vm1189_vm11, %v1188_v39 }
 0x21d PF: > { %s15_s18 = sadd.s32 1, %s1461_s18  }
 0x21e   : > { %p12_p5 = scmp.ge.s32.totalorder %s15_s18, 4  }
 0x220   :  { %14 = sbr.rel (!%p12_p5) target bundleno = 1 (0x1), region = 76 }

</bundles_post_ra>
